<compile_context>
chip_gen: v7x
topology: tpu7x:2x2x1
jax: 0.10.0
libtpu: 0.0.40
codegen_flags: <defaults>
</compile_context>

<pallas_src>
import functools

import jax
import jax.numpy as jnp
from jax import lax
from jax.experimental import pallas as pl
from jax.experimental.pallas import tpu as pltpu


# -------------------------------------------------------------------------------------
# Kernel 1a (stride==1, whole padded image per step, Nb images batched per grid step).
#   x_ref:     (Nb, Hp, Wp, Cin)   padded images
#   w_ref:     (KH*KW, Cout, Cin)  tap-major conv weights
#   b_ref:     (Cout, 1)
#   y_ref:     (Nb, Cout, hw)      conv output (spatial on lanes)
#   stats_ref: (Nb, Cout, 2)       per-image (mean, sum of squared deviations)
# -------------------------------------------------------------------------------------
def _conv_stats_whole_kernel(x_ref, w_ref, b_ref, y_ref, stats_ref,
                             *, H_out, W_out, KH, KW):
    Nb = x_ref.shape[0]
    Cin = x_ref.shape[-1]
    Cout = w_ref.shape[1]
    hw = H_out * W_out
    inv_hw = 1.0 / float(hw)
    for b in range(Nb):                                   # static unroll, Nb is small
        acc = jnp.zeros((Cout, hw), jnp.float32)
        for kh in range(KH):                              # accumulated shifted-window matmuls
            for kw in range(KW):
                win = x_ref[b, pl.ds(kh, H_out), pl.ds(kw, W_out), :].reshape(hw, Cin)
                wk = w_ref[kh * KW + kw]                  # (Cout, Cin)
                acc = acc + lax.dot_general(
                    wk, win, (((1,), (1,)), ((), ())),
                    preferred_element_type=jnp.float32)   # (Cout, hw), lane-dense
        acc = acc + b_ref[...]
        m = jnp.sum(acc, axis=1, keepdims=True) * inv_hw  # (Cout, 1)
        d = acc - m
        ssd = jnp.sum(d * d, axis=1, keepdims=True)       # (Cout, 1)
        y_ref[b] = acc.astype(y_ref.dtype)
        stats_ref[b] = jnp.concatenate([m, ssd], axis=1)  # packed (Cout, 2)


# -------------------------------------------------------------------------------------
# Kernel 1b (stride>1 or large images: wrapper-prepatched windows, tiled over hw).
#   x_ref:     (taps, hw_t, Cin)
#   w_ref:     (taps, Cout, Cin)
#   b_ref:     (Cout, 1)
#   y_ref:     (Cout, hw_t)
#   stats_ref: (Cout, 2)
# -------------------------------------------------------------------------------------
def _conv_stats_patch_kernel(x_ref, w_ref, b_ref, y_ref, stats_ref):
    taps, hw_t, _ = x_ref.shape
    Cout = w_ref.shape[1]
    acc = jnp.zeros((Cout, hw_t), jnp.float32)
    for k in range(taps):                                  # static unroll over taps
        acc = acc + lax.dot_general(
            w_ref[k], x_ref[k], (((1,), (1,)), ((), ())),
            preferred_element_type=jnp.float32)
    acc = acc + b_ref[...]
    m = jnp.sum(acc, axis=1, keepdims=True) * (1.0 / float(hw_t))
    d = acc - m
    ssd = jnp.sum(d * d, axis=1, keepdims=True)
    y_ref[...] = acc.astype(y_ref.dtype)
    stats_ref[...] = jnp.concatenate([m, ssd], axis=1)


# -------------------------------------------------------------------------------------
# Kernel 2: BN affine + ReLU, written once (lane-dense).  Upsample happens in XLA glue.
# -------------------------------------------------------------------------------------
def _bn_relu_kernel(y_ref, scale_ref, shift_ref, o_ref):
    z = y_ref[...].astype(jnp.float32) * scale_ref[...] + shift_ref[...]
    o_ref[...] = jnp.maximum(z, 0.0).astype(o_ref.dtype)


def _vmem_limit_bytes():
    cap = 64 * 1024 * 1024                                 # conservative fallback
    try:
        cap = int(pltpu.get_tpu_info().vmem_capacity_bytes)
    except Exception:
        pass
    # ~3/4 of physical VMEM: ~48 MiB on v7x (64 MiB / TC), capped at 100 MiB on v5e/v6e.
    return min((cap * 3) // 4, 100 * 1024 * 1024)


def _pick_tile(total, unit_bytes, budget):
    """Largest divisor of `total` fitting `budget`, preferring lane-aligned sizes."""
    if total * unit_bytes <= budget:
        return total
    divs = [d for d in range(1, total + 1) if total % d == 0 and d * unit_bytes <= budget]
    if not divs:
        return total
    for align in (128, 8, 1):
        aligned = [d for d in divs if d % align == 0]
        if aligned:
            return max(aligned)
    return total


def deconv_block_forward(x_nchw, conv_w, conv_b, bn_gamma, bn_beta,
                         *, stride=1, padding=1, eps=1e-5, use_bf16_mxu=False):
    N, Cin, H, W = x_nchw.shape
    Cout, _, KH, KW = conv_w.shape
    H_out = (H + 2 * padding - KH) // stride + 1
    W_out = (W + 2 * padding - KW) // stride + 1
    hw = H_out * W_out
    taps = KH * KW

    mxu_dtype = jnp.bfloat16 if use_bf16_mxu else jnp.float32
    y_dtype = jnp.bfloat16 if use_bf16_mxu else jnp.float32   # y written/read once via HBM
    in_isz = jnp.dtype(mxu_dtype).itemsize
    y_isz = jnp.dtype(y_dtype).itemsize

    vmem_limit = _vmem_limit_bytes()
    block_budget = vmem_limit // 3        # headroom for double-buffering + f32 temporaries

    # ---- glue: NHWC + spatial padding (input is the smallest tensor) ----
    x = jnp.transpose(x_nchw, (0, 2, 3, 1)).astype(jnp.float32)
    xp = jnp.pad(x, ((0, 0), (padding, padding), (padding, padding), (0, 0)))
    Hp, Wp = H + 2 * padding, W + 2 * padding

    # Weights tap-major: (KH*KW, Cout, Cin); bias (Cout, 1).
    w_t = jnp.transpose(conv_w, (2, 3, 0, 1)).reshape(taps, Cout, Cin).astype(mxu_dtype)
    b = conv_b.reshape(Cout, 1).astype(jnp.float32)

    per_img = (Hp * Wp * Cin * in_isz          # padded image block
               + Cout * hw * y_isz             # y output block
               + Cout * hw * 4)                # f32 accumulator temp
    whole_path = (stride == 1) and (per_img <= block_budget)

    if whole_path:
        nb = max(d for d in range(1, N + 1) if N % d == 0 and d * per_img <= block_budget)
        x_in = xp.astype(mxu_dtype)                               # (N, Hp, Wp, Cin)
        kern = functools.partial(_conv_stats_whole_kernel,
                                 H_out=H_out, W_out=W_out, KH=KH, KW=KW)
        grid = (N // nb,)
        in_specs = [
            pl.BlockSpec((nb, Hp, Wp, Cin), lambda g: (g, 0, 0, 0)),
            pl.BlockSpec((taps, Cout, Cin), lambda g: (0, 0, 0)),
            pl.BlockSpec((Cout, 1), lambda g: (0, 0)),
        ]
        out_specs = [
            pl.BlockSpec((nb, Cout, hw), lambda g: (g, 0, 0)),
            pl.BlockSpec((nb, Cout, 2), lambda g: (g, 0, 0)),
        ]
        stats_shape = (N, Cout, 2)
        dims = ("parallel",)
        bytes1 = ((x_in.size + w_t.size) * in_isz + N * Cout * hw * y_isz
                  + (b.size + N * Cout * 2) * 4)
    else:
        # stride > 1, or a whole image busts the VMEM budget: pre-extract the KHxKW
        # (strided) windows once in XLA; the kernel is then trivially tiled over hw.
        # TODO(synk): a halo'd manual-DMA path would keep input HBM traffic at 1x for
        #             very large stride==1 images instead of taps x.
        cols = [xp[:, kh: kh + stride * H_out: stride,
                   kw: kw + stride * W_out: stride, :]
                for kh in range(KH) for kw in range(KW)]
        x_in = jnp.stack(cols, axis=1).reshape(N, taps, hw, Cin).astype(mxu_dtype)
        unit = taps * Cin * in_isz + Cout * (y_isz + 4)           # bytes per hw element
        hw_t = _pick_tile(hw, unit, block_budget)
        n_t = hw // hw_t
        kern = _conv_stats_patch_kernel
        grid = (N, n_t)
        in_specs = [
            pl.BlockSpec((None, taps, hw_t, Cin), lambda n, t: (n, 0, t, 0)),
            pl.BlockSpec((taps, Cout, Cin), lambda n, t: (0, 0, 0)),
            pl.BlockSpec((Cout, 1), lambda n, t: (0, 0)),
        ]
        out_specs = [
            pl.BlockSpec((None, Cout, hw_t), lambda n, t: (n, 0, t)),
            pl.BlockSpec((None, None, Cout, 2), lambda n, t: (n, t, 0, 0)),
        ]
        stats_shape = (N, n_t, Cout, 2)
        dims = ("parallel", "parallel")
        bytes1 = ((x_in.size + w_t.size) * in_isz + N * Cout * hw * y_isz
                  + (b.size + N * n_t * Cout * 2) * 4)

    flops1 = 2 * N * hw * taps * Cin * Cout + 4 * N * Cout * hw

    y, stats = pl.pallas_call(
        kern,
        out_shape=(jax.ShapeDtypeStruct((N, Cout, hw), y_dtype),
                   jax.ShapeDtypeStruct(stats_shape, jnp.float32)),
        grid_spec=pltpu.PrefetchScalarGridSpec(
            num_scalar_prefetch=0, grid=grid, in_specs=in_specs, out_specs=out_specs),
        compiler_params=pltpu.CompilerParams(
            dimension_semantics=dims, vmem_limit_bytes=vmem_limit),
        cost_estimate=pl.CostEstimate(flops=flops1, transcendentals=0,
                                      bytes_accessed=bytes1),
    )(x_in, w_t, b)

    # ---- glue: exact combine of equal-size partial stats (training-mode BatchNorm) ----
    mean_g = stats[..., 0].reshape(-1, Cout)                       # (G, Cout)
    ssd_g = stats[..., 1].reshape(-1, Cout)
    groups = mean_g.shape[0]
    group_size = (N * hw) // groups
    count = N * hw
    mu = jnp.mean(mean_g, axis=0)                                  # (Cout,)
    var = (jnp.sum(ssd_g, axis=0)
           + group_size * jnp.sum((mean_g - mu) ** 2, axis=0)) / count   # biased variance
    inv_std = lax.rsqrt(var + eps)
    scale_v = bn_gamma.astype(jnp.float32) * inv_std
    shift_v = bn_beta.astype(jnp.float32) - mu * scale_v
    scale = scale_v.reshape(Cout, 1)
    shift = shift_v.reshape(Cout, 1)
    # TODO(synk): running_mean / running_var momentum buffer updates are not modeled.

    # ---- kernel 2: BN affine + ReLU, written ONCE; sized to the VMEM budget ----
    unit2 = Cout * (y_isz + 4)
    per_img2 = hw * unit2
    if per_img2 <= block_budget:
        nb2 = max(d for d in range(1, N + 1) if N % d == 0 and d * per_img2 <= block_budget)
        hw_t2 = hw
    else:
        nb2 = 1
        hw_t2 = _pick_tile(hw, unit2, block_budget)
    n_t2 = hw // hw_t2

    flops2 = 3 * N * Cout * hw
    bytes2 = N * Cout * hw * (y_isz + 4) + 2 * Cout * 4

    z = pl.pallas_call(
        _bn_relu_kernel,
        out_shape=jax.ShapeDtypeStruct((N, Cout, hw), jnp.float32),
        grid_spec=pltpu.PrefetchScalarGridSpec(
            num_scalar_prefetch=0,
            grid=(N // nb2, n_t2),
            in_specs=[
                pl.BlockSpec((nb2, Cout, hw_t2), lambda g, t: (g, 0, t)),
                pl.BlockSpec((Cout, 1), lambda g, t: (0, 0)),
                pl.BlockSpec((Cout, 1), lambda g, t: (0, 0)),
            ],
            out_specs=pl.BlockSpec((nb2, Cout, hw_t2), lambda g, t: (g, 0, t)),
        ),
        compiler_params=pltpu.CompilerParams(
            dimension_semantics=("parallel", "parallel"), vmem_limit_bytes=vmem_limit),
        cost_estimate=pl.CostEstimate(flops=flops2, transcendentals=0,
                                      bytes_accessed=bytes2),
    )(y, scale, shift)

    # ---- glue: 2x nearest upsample as a pure broadcast; output is already channel-major
    #            so NO transpose is needed.  out[n,c,2h+i,2w+j] = z[n,c,h,w]. ----
    z = z.reshape(N, Cout, H_out, W_out)
    up = jnp.broadcast_to(z[:, :, :, None, :, None], (N, Cout, H_out, 2, W_out, 2))
    return up.reshape(N, Cout, 2 * H_out, 2 * W_out)


def _reference(x_nchw, conv_w, conv_b, gamma, beta, stride, padding, eps=1e-5):
    y = lax.conv_general_dilated(
        x_nchw, conv_w, window_strides=(stride, stride),
        padding=[(padding, padding), (padding, padding)],
        dimension_numbers=("NCHW", "OIHW", "NCHW"))
    y = y + conv_b.reshape(1, -1, 1, 1)
    mean = jnp.mean(y, axis=(0, 2, 3), keepdims=True)
    var = jnp.mean((y - mean) ** 2, axis=(0, 2, 3), keepdims=True)
    y = gamma.reshape(1, -1, 1, 1) * (y - mean) / jnp.sqrt(var + eps) \
        + beta.reshape(1, -1, 1, 1)
    y = jnp.maximum(y, 0.0)
    return jnp.repeat(jnp.repeat(y, 2, axis=2), 2, axis=3)


if __name__ == "__main__":
    N, Cin, Cout, H, W = 2, 4, 8, 16, 16
    KH = KW = 3

    key = jax.random.PRNGKey(0)
    k1, k2, k3, k4, k5 = jax.random.split(key, 5)
    x = jax.random.normal(k1, (N, Cin, H, W), jnp.float32)
    conv_w = 0.1 * jax.random.normal(k2, (Cout, Cin, KH, KW), jnp.float32)
    conv_b = 0.1 * jax.random.normal(k3, (Cout,), jnp.float32)
    bn_gamma = 1.0 + 0.1 * jax.random.normal(k4, (Cout,), jnp.float32)
    bn_beta = 0.1 * jax.random.normal(k5, (Cout,), jnp.float32)

    # stride=1 exercises the in-kernel shifted-window path; stride=2 the prepatched path.
    for stride, padding in ((1, 1), (2, 1)):
        ref = _reference(x, conv_w, conv_b, bn_gamma, bn_beta, stride, padding)
        H_out = (H + 2 * padding - KH) // stride + 1
        W_out = (W + 2 * padding - KW) // stride + 1
        # f32 path: strict tolerance; bf16 MXU path: loose sanity tolerance.
        for use_bf16, atol in ((False, 1e-3), (True, 1e-1)):
            out = deconv_block_forward(x, conv_w, conv_b, bn_gamma, bn_beta,
                                       stride=stride, padding=padding,
                                       use_bf16_mxu=use_bf16)
            out = jax.block_until_ready(out)
            assert out.shape == ref.shape == (N, Cout, 2 * H_out, 2 * W_out), \
                (out.shape, ref.shape)
            max_err = float(jnp.max(jnp.abs(out - ref)))
            assert max_err < atol, f"stride={stride} bf16={use_bf16} max abs err {max_err}"

    print("KERNEL_OK")
</pallas_src>

<mosaic_0001>
module attributes {stable_mosaic.version = 11 : i64} {
  func.func @_conv_stats_whole_kernel(%arg0: i32, %arg1: memref<2x18x18x4xf32, #tpu.memory_space<vmem>>, %arg2: memref<9x8x4xf32, #tpu.memory_space<vmem>>, %arg3: memref<8x1xf32, #tpu.memory_space<vmem>>, %arg4: memref<2x8x256xf32, #tpu.memory_space<vmem>>, %arg5: memref<2x8x2xf32, #tpu.memory_space<vmem>>) attributes {dimension_semantics = [#tpu.dimension_semantics<parallel>], iteration_bounds = array<i64: 1>, scalar_prefetch = 0 : i64, scratch_operands = 0 : i64, tpu.core_type = #tpu.core_type<tc>, window_params = [{transform_indices = @transform_0, window_bounds = array<i64: 2, 18, 18, 4>}, {pipeline_mode = #tpu.pipeline_mode<synchronous>, transform_indices = @transform_1, window_bounds = array<i64: 9, 8, 4>}, {pipeline_mode = #tpu.pipeline_mode<synchronous>, transform_indices = @transform_2, window_bounds = array<i64: 8, 1>}, {transform_indices = @transform_3, window_bounds = array<i64: 2, 8, 256>}, {transform_indices = @transform_4, window_bounds = array<i64: 2, 8, 2>}]} {
    %cst = arith.constant 0.000000e+00 : f32
    %0 = vector.broadcast %cst : f32 to vector<8x256xf32>
    %c0 = arith.constant 0 : index
    %c0_0 = arith.constant 0 : index
    %c0_1 = arith.constant 0 : index
    %c0_2 = arith.constant 0 : index
    %1 = vector.load %arg1[%c0, %c0_0, %c0_1, %c0_2] : memref<2x18x18x4xf32, #tpu.memory_space<vmem>>, vector<1x16x16x4xf32>
    %2 = vector.shape_cast %1 : vector<1x16x16x4xf32> to vector<16x16x4xf32>
    %3 = vector.shape_cast %2 : vector<16x16x4xf32> to vector<256x4xf32>
    %c0_3 = arith.constant 0 : index
    %c0_4 = arith.constant 0 : index
    %c0_5 = arith.constant 0 : index
    %4 = vector.load %arg2[%c0_3, %c0_4, %c0_5] : memref<9x8x4xf32, #tpu.memory_space<vmem>>, vector<1x8x4xf32>
    %5 = vector.shape_cast %4 : vector<1x8x4xf32> to vector<8x4xf32>
    %cst_6 = arith.constant dense<0.000000e+00> : vector<8x256xf32>
    %6 = tpu.matmul %5, %3, %cst_6 {dimension_numbers = #tpu.dot_dimension_numbers<[1], [1], [0], [0], [0, 0, 1, 0], [], []>} : vector<8x4xf32>, vector<256x4xf32>, vector<8x256xf32> -> vector<8x256xf32>
    %7 = arith.addf %0, %6 : vector<8x256xf32>
    %c0_7 = arith.constant 0 : index
    %c0_8 = arith.constant 0 : index
    %c1 = arith.constant 1 : index
    %c0_9 = arith.constant 0 : index
    %8 = vector.load %arg1[%c0_7, %c0_8, %c1, %c0_9] : memref<2x18x18x4xf32, #tpu.memory_space<vmem>>, vector<1x16x16x4xf32>
    %9 = vector.shape_cast %8 : vector<1x16x16x4xf32> to vector<16x16x4xf32>
    %10 = vector.shape_cast %9 : vector<16x16x4xf32> to vector<256x4xf32>
    %c1_10 = arith.constant 1 : index
    %c0_11 = arith.constant 0 : index
    %c0_12 = arith.constant 0 : index
    %11 = vector.load %arg2[%c1_10, %c0_11, %c0_12] : memref<9x8x4xf32, #tpu.memory_space<vmem>>, vector<1x8x4xf32>
    %12 = vector.shape_cast %11 : vector<1x8x4xf32> to vector<8x4xf32>
    %cst_13 = arith.constant dense<0.000000e+00> : vector<8x256xf32>
    %13 = tpu.matmul %12, %10, %cst_13 {dimension_numbers = #tpu.dot_dimension_numbers<[1], [1], [0], [0], [0, 0, 1, 0], [], []>} : vector<8x4xf32>, vector<256x4xf32>, vector<8x256xf32> -> vector<8x256xf32>
    %14 = arith.addf %7, %13 : vector<8x256xf32>
    %c0_14 = arith.constant 0 : index
    %c0_15 = arith.constant 0 : index
    %c2 = arith.constant 2 : index
    %c0_16 = arith.constant 0 : index
    %15 = vector.load %arg1[%c0_14, %c0_15, %c2, %c0_16] : memref<2x18x18x4xf32, #tpu.memory_space<vmem>>, vector<1x16x16x4xf32>
    %16 = vector.shape_cast %15 : vector<1x16x16x4xf32> to vector<16x16x4xf32>
    %17 = vector.shape_cast %16 : vector<16x16x4xf32> to vector<256x4xf32>
    %c2_17 = arith.constant 2 : index
    %c0_18 = arith.constant 0 : index
    %c0_19 = arith.constant 0 : index
    %18 = vector.load %arg2[%c2_17, %c0_18, %c0_19] : memref<9x8x4xf32, #tpu.memory_space<vmem>>, vector<1x8x4xf32>
    %19 = vector.shape_cast %18 : vector<1x8x4xf32> to vector<8x4xf32>
    %cst_20 = arith.constant dense<0.000000e+00> : vector<8x256xf32>
    %20 = tpu.matmul %19, %17, %cst_20 {dimension_numbers = #tpu.dot_dimension_numbers<[1], [1], [0], [0], [0, 0, 1, 0], [], []>} : vector<8x4xf32>, vector<256x4xf32>, vector<8x256xf32> -> vector<8x256xf32>
    %21 = arith.addf %14, %20 : vector<8x256xf32>
    %c0_21 = arith.constant 0 : index
    %c1_22 = arith.constant 1 : index
    %c0_23 = arith.constant 0 : index
    %c0_24 = arith.constant 0 : index
    %22 = vector.load %arg1[%c0_21, %c1_22, %c0_23, %c0_24] : memref<2x18x18x4xf32, #tpu.memory_space<vmem>>, vector<1x16x16x4xf32>
    %23 = vector.shape_cast %22 : vector<1x16x16x4xf32> to vector<16x16x4xf32>
    %24 = vector.shape_cast %23 : vector<16x16x4xf32> to vector<256x4xf32>
    %c3 = arith.constant 3 : index
    %c0_25 = arith.constant 0 : index
    %c0_26 = arith.constant 0 : index
    %25 = vector.load %arg2[%c3, %c0_25, %c0_26] : memref<9x8x4xf32, #tpu.memory_space<vmem>>, vector<1x8x4xf32>
    %26 = vector.shape_cast %25 : vector<1x8x4xf32> to vector<8x4xf32>
    %cst_27 = arith.constant dense<0.000000e+00> : vector<8x256xf32>
    %27 = tpu.matmul %26, %24, %cst_27 {dimension_numbers = #tpu.dot_dimension_numbers<[1], [1], [0], [0], [0, 0, 1, 0], [], []>} : vector<8x4xf32>, vector<256x4xf32>, vector<8x256xf32> -> vector<8x256xf32>
    %28 = arith.addf %21, %27 : vector<8x256xf32>
    %c0_28 = arith.constant 0 : index
    %c1_29 = arith.constant 1 : index
    %c1_30 = arith.constant 1 : index
    %c0_31 = arith.constant 0 : index
    %29 = vector.load %arg1[%c0_28, %c1_29, %c1_30, %c0_31] : memref<2x18x18x4xf32, #tpu.memory_space<vmem>>, vector<1x16x16x4xf32>
    %30 = vector.shape_cast %29 : vector<1x16x16x4xf32> to vector<16x16x4xf32>
    %31 = vector.shape_cast %30 : vector<16x16x4xf32> to vector<256x4xf32>
    %c4 = arith.constant 4 : index
    %c0_32 = arith.constant 0 : index
    %c0_33 = arith.constant 0 : index
    %32 = vector.load %arg2[%c4, %c0_32, %c0_33] : memref<9x8x4xf32, #tpu.memory_space<vmem>>, vector<1x8x4xf32>
    %33 = vector.shape_cast %32 : vector<1x8x4xf32> to vector<8x4xf32>
    %cst_34 = arith.constant dense<0.000000e+00> : vector<8x256xf32>
    %34 = tpu.matmul %33, %31, %cst_34 {dimension_numbers = #tpu.dot_dimension_numbers<[1], [1], [0], [0], [0, 0, 1, 0], [], []>} : vector<8x4xf32>, vector<256x4xf32>, vector<8x256xf32> -> vector<8x256xf32>
    %35 = arith.addf %28, %34 : vector<8x256xf32>
    %c0_35 = arith.constant 0 : index
    %c1_36 = arith.constant 1 : index
    %c2_37 = arith.constant 2 : index
    %c0_38 = arith.constant 0 : index
    %36 = vector.load %arg1[%c0_35, %c1_36, %c2_37, %c0_38] : memref<2x18x18x4xf32, #tpu.memory_space<vmem>>, vector<1x16x16x4xf32>
    %37 = vector.shape_cast %36 : vector<1x16x16x4xf32> to vector<16x16x4xf32>
    %38 = vector.shape_cast %37 : vector<16x16x4xf32> to vector<256x4xf32>
    %c5 = arith.constant 5 : index
    %c0_39 = arith.constant 0 : index
    %c0_40 = arith.constant 0 : index
    %39 = vector.load %arg2[%c5, %c0_39, %c0_40] : memref<9x8x4xf32, #tpu.memory_space<vmem>>, vector<1x8x4xf32>
    %40 = vector.shape_cast %39 : vector<1x8x4xf32> to vector<8x4xf32>
    %cst_41 = arith.constant dense<0.000000e+00> : vector<8x256xf32>
    %41 = tpu.matmul %40, %38, %cst_41 {dimension_numbers = #tpu.dot_dimension_numbers<[1], [1], [0], [0], [0, 0, 1, 0], [], []>} : vector<8x4xf32>, vector<256x4xf32>, vector<8x256xf32> -> vector<8x256xf32>
    %42 = arith.addf %35, %41 : vector<8x256xf32>
    %c0_42 = arith.constant 0 : index
    %c2_43 = arith.constant 2 : index
    %c0_44 = arith.constant 0 : index
    %c0_45 = arith.constant 0 : index
    %43 = vector.load %arg1[%c0_42, %c2_43, %c0_44, %c0_45] : memref<2x18x18x4xf32, #tpu.memory_space<vmem>>, vector<1x16x16x4xf32>
    %44 = vector.shape_cast %43 : vector<1x16x16x4xf32> to vector<16x16x4xf32>
    %45 = vector.shape_cast %44 : vector<16x16x4xf32> to vector<256x4xf32>
    %c6 = arith.constant 6 : index
    %c0_46 = arith.constant 0 : index
    %c0_47 = arith.constant 0 : index
    %46 = vector.load %arg2[%c6, %c0_46, %c0_47] : memref<9x8x4xf32, #tpu.memory_space<vmem>>, vector<1x8x4xf32>
    %47 = vector.shape_cast %46 : vector<1x8x4xf32> to vector<8x4xf32>
    %cst_48 = arith.constant dense<0.000000e+00> : vector<8x256xf32>
    %48 = tpu.matmul %47, %45, %cst_48 {dimension_numbers = #tpu.dot_dimension_numbers<[1], [1], [0], [0], [0, 0, 1, 0], [], []>} : vector<8x4xf32>, vector<256x4xf32>, vector<8x256xf32> -> vector<8x256xf32>
    %49 = arith.addf %42, %48 : vector<8x256xf32>
    %c0_49 = arith.constant 0 : index
    %c2_50 = arith.constant 2 : index
    %c1_51 = arith.constant 1 : index
    %c0_52 = arith.constant 0 : index
    %50 = vector.load %arg1[%c0_49, %c2_50, %c1_51, %c0_52] : memref<2x18x18x4xf32, #tpu.memory_space<vmem>>, vector<1x16x16x4xf32>
    %51 = vector.shape_cast %50 : vector<1x16x16x4xf32> to vector<16x16x4xf32>
    %52 = vector.shape_cast %51 : vector<16x16x4xf32> to vector<256x4xf32>
    %c7 = arith.constant 7 : index
    %c0_53 = arith.constant 0 : index
    %c0_54 = arith.constant 0 : index
    %53 = vector.load %arg2[%c7, %c0_53, %c0_54] : memref<9x8x4xf32, #tpu.memory_space<vmem>>, vector<1x8x4xf32>
    %54 = vector.shape_cast %53 : vector<1x8x4xf32> to vector<8x4xf32>
    %cst_55 = arith.constant dense<0.000000e+00> : vector<8x256xf32>
    %55 = tpu.matmul %54, %52, %cst_55 {dimension_numbers = #tpu.dot_dimension_numbers<[1], [1], [0], [0], [0, 0, 1, 0], [], []>} : vector<8x4xf32>, vector<256x4xf32>, vector<8x256xf32> -> vector<8x256xf32>
    %56 = arith.addf %49, %55 : vector<8x256xf32>
    %c0_56 = arith.constant 0 : index
    %c2_57 = arith.constant 2 : index
    %c2_58 = arith.constant 2 : index
    %c0_59 = arith.constant 0 : index
    %57 = vector.load %arg1[%c0_56, %c2_57, %c2_58, %c0_59] : memref<2x18x18x4xf32, #tpu.memory_space<vmem>>, vector<1x16x16x4xf32>
    %58 = vector.shape_cast %57 : vector<1x16x16x4xf32> to vector<16x16x4xf32>
    %59 = vector.shape_cast %58 : vector<16x16x4xf32> to vector<256x4xf32>
    %c8 = arith.constant 8 : index
    %c0_60 = arith.constant 0 : index
    %c0_61 = arith.constant 0 : index
    %60 = vector.load %arg2[%c8, %c0_60, %c0_61] : memref<9x8x4xf32, #tpu.memory_space<vmem>>, vector<1x8x4xf32>
    %61 = vector.shape_cast %60 : vector<1x8x4xf32> to vector<8x4xf32>
    %cst_62 = arith.constant dense<0.000000e+00> : vector<8x256xf32>
    %62 = tpu.matmul %61, %59, %cst_62 {dimension_numbers = #tpu.dot_dimension_numbers<[1], [1], [0], [0], [0, 0, 1, 0], [], []>} : vector<8x4xf32>, vector<256x4xf32>, vector<8x256xf32> -> vector<8x256xf32>
    %63 = arith.addf %56, %62 : vector<8x256xf32>
    %c0_63 = arith.constant 0 : index
    %c0_64 = arith.constant 0 : index
    %64 = vector.load %arg3[%c0_63, %c0_64] : memref<8x1xf32, #tpu.memory_space<vmem>>, vector<8x1xf32>
    %65 = vector.broadcast %64 : vector<8x1xf32> to vector<8x256xf32>
    %66 = arith.addf %63, %65 : vector<8x256xf32>
    %cst_65 = arith.constant dense<0.000000e+00> : vector<8xf32>
    %67 = vector.multi_reduction <add>, %66, %cst_65 [1] : vector<8x256xf32> to vector<8xf32>
    %68 = vector.shape_cast %67 : vector<8xf32> to vector<8x1xf32>
    %cst_66 = arith.constant 3.906250e-03 : f32
    %69 = vector.broadcast %cst_66 : f32 to vector<8x1xf32>
    %70 = arith.mulf %68, %69 : vector<8x1xf32>
    %71 = vector.broadcast %70 : vector<8x1xf32> to vector<8x256xf32>
    %72 = arith.subf %66, %71 : vector<8x256xf32>
    %73 = arith.mulf %72, %72 : vector<8x256xf32>
    %cst_67 = arith.constant dense<0.000000e+00> : vector<8xf32>
    %74 = vector.multi_reduction <add>, %73, %cst_67 [1] : vector<8x256xf32> to vector<8xf32>
    %75 = vector.shape_cast %74 : vector<8xf32> to vector<8x1xf32>
    %c0_68 = arith.constant 0 : index
    %c0_69 = arith.constant 0 : index
    %c0_70 = arith.constant 0 : index
    %76 = vector.load %arg4[%c0_68, %c0_69, %c0_70] : memref<2x8x256xf32, #tpu.memory_space<vmem>>, vector<1x8x256xf32>
    %77 = vector.shape_cast %76 : vector<1x8x256xf32> to vector<8x256xf32>
    %78 = vector.shape_cast %66 : vector<8x256xf32> to vector<1x8x256xf32>
    tpu.vector_store %arg4[%c0_68, %c0_69, %c0_70], %78 {strides = array<i32>} : memref<2x8x256xf32, #tpu.memory_space<vmem>>, vector<1x8x256xf32>,
    %79 = tpu.concatenate %70, %75 in 1 : vector<8x1xf32>, vector<8x1xf32> -> vector<8x2xf32>
    %c0_71 = arith.constant 0 : index
    %c0_72 = arith.constant 0 : index
    %c0_73 = arith.constant 0 : index
    %80 = vector.load %arg5[%c0_71, %c0_72, %c0_73] : memref<2x8x2xf32, #tpu.memory_space<vmem>>, vector<1x8x2xf32>
    %81 = vector.shape_cast %80 : vector<1x8x2xf32> to vector<8x2xf32>
    %82 = vector.shape_cast %79 : vector<8x2xf32> to vector<1x8x2xf32>
    tpu.vector_store %arg5[%c0_71, %c0_72, %c0_73], %82 {strides = array<i32>} : memref<2x8x2xf32, #tpu.memory_space<vmem>>, vector<1x8x2xf32>,
    %cst_74 = arith.constant 0.000000e+00 : f32
    %83 = vector.broadcast %cst_74 : f32 to vector<8x256xf32>
    %c1_75 = arith.constant 1 : index
    %c0_76 = arith.constant 0 : index
    %c0_77 = arith.constant 0 : index
    %c0_78 = arith.constant 0 : index
    %84 = vector.load %arg1[%c1_75, %c0_76, %c0_77, %c0_78] : memref<2x18x18x4xf32, #tpu.memory_space<vmem>>, vector<1x16x16x4xf32>
    %85 = vector.shape_cast %84 : vector<1x16x16x4xf32> to vector<16x16x4xf32>
    %86 = vector.shape_cast %85 : vector<16x16x4xf32> to vector<256x4xf32>
    %c0_79 = arith.constant 0 : index
    %c0_80 = arith.constant 0 : index
    %c0_81 = arith.constant 0 : index
    %87 = vector.load %arg2[%c0_79, %c0_80, %c0_81] : memref<9x8x4xf32, #tpu.memory_space<vmem>>, vector<1x8x4xf32>
    %88 = vector.shape_cast %87 : vector<1x8x4xf32> to vector<8x4xf32>
    %cst_82 = arith.constant dense<0.000000e+00> : vector<8x256xf32>
    %89 = tpu.matmul %88, %86, %cst_82 {dimension_numbers = #tpu.dot_dimension_numbers<[1], [1], [0], [0], [0, 0, 1, 0], [], []>} : vector<8x4xf32>, vector<256x4xf32>, vector<8x256xf32> -> vector<8x256xf32>
    %90 = arith.addf %83, %89 : vector<8x256xf32>
    %c1_83 = arith.constant 1 : index
    %c0_84 = arith.constant 0 : index
    %c1_85 = arith.constant 1 : index
    %c0_86 = arith.constant 0 : index
    %91 = vector.load %arg1[%c1_83, %c0_84, %c1_85, %c0_86] : memref<2x18x18x4xf32, #tpu.memory_space<vmem>>, vector<1x16x16x4xf32>
    %92 = vector.shape_cast %91 : vector<1x16x16x4xf32> to vector<16x16x4xf32>
    %93 = vector.shape_cast %92 : vector<16x16x4xf32> to vector<256x4xf32>
    %c1_87 = arith.constant 1 : index
    %c0_88 = arith.constant 0 : index
    %c0_89 = arith.constant 0 : index
    %94 = vector.load %arg2[%c1_87, %c0_88, %c0_89] : memref<9x8x4xf32, #tpu.memory_space<vmem>>, vector<1x8x4xf32>
    %95 = vector.shape_cast %94 : vector<1x8x4xf32> to vector<8x4xf32>
    %cst_90 = arith.constant dense<0.000000e+00> : vector<8x256xf32>
    %96 = tpu.matmul %95, %93, %cst_90 {dimension_numbers = #tpu.dot_dimension_numbers<[1], [1], [0], [0], [0, 0, 1, 0], [], []>} : vector<8x4xf32>, vector<256x4xf32>, vector<8x256xf32> -> vector<8x256xf32>
    %97 = arith.addf %90, %96 : vector<8x256xf32>
    %c1_91 = arith.constant 1 : index
    %c0_92 = arith.constant 0 : index
    %c2_93 = arith.constant 2 : index
    %c0_94 = arith.constant 0 : index
    %98 = vector.load %arg1[%c1_91, %c0_92, %c2_93, %c0_94] : memref<2x18x18x4xf32, #tpu.memory_space<vmem>>, vector<1x16x16x4xf32>
    %99 = vector.shape_cast %98 : vector<1x16x16x4xf32> to vector<16x16x4xf32>
    %100 = vector.shape_cast %99 : vector<16x16x4xf32> to vector<256x4xf32>
    %c2_95 = arith.constant 2 : index
    %c0_96 = arith.constant 0 : index
    %c0_97 = arith.constant 0 : index
    %101 = vector.load %arg2[%c2_95, %c0_96, %c0_97] : memref<9x8x4xf32, #tpu.memory_space<vmem>>, vector<1x8x4xf32>
    %102 = vector.shape_cast %101 : vector<1x8x4xf32> to vector<8x4xf32>
    %cst_98 = arith.constant dense<0.000000e+00> : vector<8x256xf32>
    %103 = tpu.matmul %102, %100, %cst_98 {dimension_numbers = #tpu.dot_dimension_numbers<[1], [1], [0], [0], [0, 0, 1, 0], [], []>} : vector<8x4xf32>, vector<256x4xf32>, vector<8x256xf32> -> vector<8x256xf32>
    %104 = arith.addf %97, %103 : vector<8x256xf32>
    %c1_99 = arith.constant 1 : index
    %c1_100 = arith.constant 1 : index
    %c0_101 = arith.constant 0 : index
    %c0_102 = arith.constant 0 : index
    %105 = vector.load %arg1[%c1_99, %c1_100, %c0_101, %c0_102] : memref<2x18x18x4xf32, #tpu.memory_space<vmem>>, vector<1x16x16x4xf32>
    %106 = vector.shape_cast %105 : vector<1x16x16x4xf32> to vector<16x16x4xf32>
    %107 = vector.shape_cast %106 : vector<16x16x4xf32> to vector<256x4xf32>
    %c3_103 = arith.constant 3 : index
    %c0_104 = arith.constant 0 : index
    %c0_105 = arith.constant 0 : index
    %108 = vector.load %arg2[%c3_103, %c0_104, %c0_105] : memref<9x8x4xf32, #tpu.memory_space<vmem>>, vector<1x8x4xf32>
    %109 = vector.shape_cast %108 : vector<1x8x4xf32> to vector<8x4xf32>
    %cst_106 = arith.constant dense<0.000000e+00> : vector<8x256xf32>
    %110 = tpu.matmul %109, %107, %cst_106 {dimension_numbers = #tpu.dot_dimension_numbers<[1], [1], [0], [0], [0, 0, 1, 0], [], []>} : vector<8x4xf32>, vector<256x4xf32>, vector<8x256xf32> -> vector<8x256xf32>
    %111 = arith.addf %104, %110 : vector<8x256xf32>
    %c1_107 = arith.constant 1 : index
    %c1_108 = arith.constant 1 : index
    %c1_109 = arith.constant 1 : index
    %c0_110 = arith.constant 0 : index
    %112 = vector.load %arg1[%c1_107, %c1_108, %c1_109, %c0_110] : memref<2x18x18x4xf32, #tpu.memory_space<vmem>>, vector<1x16x16x4xf32>
    %113 = vector.shape_cast %112 : vector<1x16x16x4xf32> to vector<16x16x4xf32>
    %114 = vector.shape_cast %113 : vector<16x16x4xf32> to vector<256x4xf32>
    %c4_111 = arith.constant 4 : index
    %c0_112 = arith.constant 0 : index
    %c0_113 = arith.constant 0 : index
    %115 = vector.load %arg2[%c4_111, %c0_112, %c0_113] : memref<9x8x4xf32, #tpu.memory_space<vmem>>, vector<1x8x4xf32>
    %116 = vector.shape_cast %115 : vector<1x8x4xf32> to vector<8x4xf32>
    %cst_114 = arith.constant dense<0.000000e+00> : vector<8x256xf32>
    %117 = tpu.matmul %116, %114, %cst_114 {dimension_numbers = #tpu.dot_dimension_numbers<[1], [1], [0], [0], [0, 0, 1, 0], [], []>} : vector<8x4xf32>, vector<256x4xf32>, vector<8x256xf32> -> vector<8x256xf32>
    %118 = arith.addf %111, %117 : vector<8x256xf32>
    %c1_115 = arith.constant 1 : index
    %c1_116 = arith.constant 1 : index
    %c2_117 = arith.constant 2 : index
    %c0_118 = arith.constant 0 : index
    %119 = vector.load %arg1[%c1_115, %c1_116, %c2_117, %c0_118] : memref<2x18x18x4xf32, #tpu.memory_space<vmem>>, vector<1x16x16x4xf32>
    %120 = vector.shape_cast %119 : vector<1x16x16x4xf32> to vector<16x16x4xf32>
    %121 = vector.shape_cast %120 : vector<16x16x4xf32> to vector<256x4xf32>
    %c5_119 = arith.constant 5 : index
    %c0_120 = arith.constant 0 : index
    %c0_121 = arith.constant 0 : index
    %122 = vector.load %arg2[%c5_119, %c0_120, %c0_121] : memref<9x8x4xf32, #tpu.memory_space<vmem>>, vector<1x8x4xf32>
    %123 = vector.shape_cast %122 : vector<1x8x4xf32> to vector<8x4xf32>
    %cst_122 = arith.constant dense<0.000000e+00> : vector<8x256xf32>
    %124 = tpu.matmul %123, %121, %cst_122 {dimension_numbers = #tpu.dot_dimension_numbers<[1], [1], [0], [0], [0, 0, 1, 0], [], []>} : vector<8x4xf32>, vector<256x4xf32>, vector<8x256xf32> -> vector<8x256xf32>
    %125 = arith.addf %118, %124 : vector<8x256xf32>
    %c1_123 = arith.constant 1 : index
    %c2_124 = arith.constant 2 : index
    %c0_125 = arith.constant 0 : index
    %c0_126 = arith.constant 0 : index
    %126 = vector.load %arg1[%c1_123, %c2_124, %c0_125, %c0_126] : memref<2x18x18x4xf32, #tpu.memory_space<vmem>>, vector<1x16x16x4xf32>
    %127 = vector.shape_cast %126 : vector<1x16x16x4xf32> to vector<16x16x4xf32>
    %128 = vector.shape_cast %127 : vector<16x16x4xf32> to vector<256x4xf32>
    %c6_127 = arith.constant 6 : index
    %c0_128 = arith.constant 0 : index
    %c0_129 = arith.constant 0 : index
    %129 = vector.load %arg2[%c6_127, %c0_128, %c0_129] : memref<9x8x4xf32, #tpu.memory_space<vmem>>, vector<1x8x4xf32>
    %130 = vector.shape_cast %129 : vector<1x8x4xf32> to vector<8x4xf32>
    %cst_130 = arith.constant dense<0.000000e+00> : vector<8x256xf32>
    %131 = tpu.matmul %130, %128, %cst_130 {dimension_numbers = #tpu.dot_dimension_numbers<[1], [1], [0], [0], [0, 0, 1, 0], [], []>} : vector<8x4xf32>, vector<256x4xf32>, vector<8x256xf32> -> vector<8x256xf32>
    %132 = arith.addf %125, %131 : vector<8x256xf32>
    %c1_131 = arith.constant 1 : index
    %c2_132 = arith.constant 2 : index
    %c1_133 = arith.constant 1 : index
    %c0_134 = arith.constant 0 : index
    %133 = vector.load %arg1[%c1_131, %c2_132, %c1_133, %c0_134] : memref<2x18x18x4xf32, #tpu.memory_space<vmem>>, vector<1x16x16x4xf32>
    %134 = vector.shape_cast %133 : vector<1x16x16x4xf32> to vector<16x16x4xf32>
    %135 = vector.shape_cast %134 : vector<16x16x4xf32> to vector<256x4xf32>
    %c7_135 = arith.constant 7 : index
    %c0_136 = arith.constant 0 : index
    %c0_137 = arith.constant 0 : index
    %136 = vector.load %arg2[%c7_135, %c0_136, %c0_137] : memref<9x8x4xf32, #tpu.memory_space<vmem>>, vector<1x8x4xf32>
    %137 = vector.shape_cast %136 : vector<1x8x4xf32> to vector<8x4xf32>
    %cst_138 = arith.constant dense<0.000000e+00> : vector<8x256xf32>
    %138 = tpu.matmul %137, %135, %cst_138 {dimension_numbers = #tpu.dot_dimension_numbers<[1], [1], [0], [0], [0, 0, 1, 0], [], []>} : vector<8x4xf32>, vector<256x4xf32>, vector<8x256xf32> -> vector<8x256xf32>
    %139 = arith.addf %132, %138 : vector<8x256xf32>
    %c1_139 = arith.constant 1 : index
    %c2_140 = arith.constant 2 : index
    %c2_141 = arith.constant 2 : index
    %c0_142 = arith.constant 0 : index
    %140 = vector.load %arg1[%c1_139, %c2_140, %c2_141, %c0_142] : memref<2x18x18x4xf32, #tpu.memory_space<vmem>>, vector<1x16x16x4xf32>
    %141 = vector.shape_cast %140 : vector<1x16x16x4xf32> to vector<16x16x4xf32>
    %142 = vector.shape_cast %141 : vector<16x16x4xf32> to vector<256x4xf32>
    %c8_143 = arith.constant 8 : index
    %c0_144 = arith.constant 0 : index
    %c0_145 = arith.constant 0 : index
    %143 = vector.load %arg2[%c8_143, %c0_144, %c0_145] : memref<9x8x4xf32, #tpu.memory_space<vmem>>, vector<1x8x4xf32>
    %144 = vector.shape_cast %143 : vector<1x8x4xf32> to vector<8x4xf32>
    %cst_146 = arith.constant dense<0.000000e+00> : vector<8x256xf32>
    %145 = tpu.matmul %144, %142, %cst_146 {dimension_numbers = #tpu.dot_dimension_numbers<[1], [1], [0], [0], [0, 0, 1, 0], [], []>} : vector<8x4xf32>, vector<256x4xf32>, vector<8x256xf32> -> vector<8x256xf32>
    %146 = arith.addf %139, %145 : vector<8x256xf32>
    %c0_147 = arith.constant 0 : index
    %c0_148 = arith.constant 0 : index
    %147 = vector.load %arg3[%c0_147, %c0_148] : memref<8x1xf32, #tpu.memory_space<vmem>>, vector<8x1xf32>
    %148 = vector.broadcast %147 : vector<8x1xf32> to vector<8x256xf32>
    %149 = arith.addf %146, %148 : vector<8x256xf32>
    %cst_149 = arith.constant dense<0.000000e+00> : vector<8xf32>
    %150 = vector.multi_reduction <add>, %149, %cst_149 [1] : vector<8x256xf32> to vector<8xf32>
    %151 = vector.shape_cast %150 : vector<8xf32> to vector<8x1xf32>
    %cst_150 = arith.constant 3.906250e-03 : f32
    %152 = vector.broadcast %cst_150 : f32 to vector<8x1xf32>
    %153 = arith.mulf %151, %152 : vector<8x1xf32>
    %154 = vector.broadcast %153 : vector<8x1xf32> to vector<8x256xf32>
    %155 = arith.subf %149, %154 : vector<8x256xf32>
    %156 = arith.mulf %155, %155 : vector<8x256xf32>
    %cst_151 = arith.constant dense<0.000000e+00> : vector<8xf32>
    %157 = vector.multi_reduction <add>, %156, %cst_151 [1] : vector<8x256xf32> to vector<8xf32>
    %158 = vector.shape_cast %157 : vector<8xf32> to vector<8x1xf32>
    %c1_152 = arith.constant 1 : index
    %c0_153 = arith.constant 0 : index
    %c0_154 = arith.constant 0 : index
    %159 = vector.load %arg4[%c1_152, %c0_153, %c0_154] : memref<2x8x256xf32, #tpu.memory_space<vmem>>, vector<1x8x256xf32>
    %160 = vector.shape_cast %159 : vector<1x8x256xf32> to vector<8x256xf32>
    %161 = vector.shape_cast %149 : vector<8x256xf32> to vector<1x8x256xf32>
    tpu.vector_store %arg4[%c1_152, %c0_153, %c0_154], %161 {strides = array<i32>} : memref<2x8x256xf32, #tpu.memory_space<vmem>>, vector<1x8x256xf32>,
    %162 = tpu.concatenate %153, %158 in 1 : vector<8x1xf32>, vector<8x1xf32> -> vector<8x2xf32>
    %c1_155 = arith.constant 1 : index
    %c0_156 = arith.constant 0 : index
    %c0_157 = arith.constant 0 : index
    %163 = vector.load %arg5[%c1_155, %c0_156, %c0_157] : memref<2x8x2xf32, #tpu.memory_space<vmem>>, vector<1x8x2xf32>
    %164 = vector.shape_cast %163 : vector<1x8x2xf32> to vector<8x2xf32>
    %165 = vector.shape_cast %162 : vector<8x2xf32> to vector<1x8x2xf32>
    tpu.vector_store %arg5[%c1_155, %c0_156, %c0_157], %165 {strides = array<i32>} : memref<2x8x2xf32, #tpu.memory_space<vmem>>, vector<1x8x2xf32>,
    return
  }
  func.func @transform_0(%arg0: i32) -> (i32, i32, i32, i32) {
    %c0_i32 = arith.constant 0 : i32
    %c0_i32_0 = arith.constant 0 : i32
    %c0_i32_1 = arith.constant 0 : i32
    %c0_i32_2 = arith.constant 0 : i32
    return %arg0, %c0_i32, %c0_i32_0, %c0_i32_1 : i32, i32, i32, i32
  }
  func.func @transform_1(%arg0: i32) -> (i32, i32, i32) {
    %c0_i32 = arith.constant 0 : i32
    %c0_i32_0 = arith.constant 0 : i32
    %c0_i32_1 = arith.constant 0 : i32
    %c0_i32_2 = arith.constant 0 : i32
    return %c0_i32, %c0_i32_0, %c0_i32_1 : i32, i32, i32
  }
  func.func @transform_2(%arg0: i32) -> (i32, i32) {
    %c0_i32 = arith.constant 0 : i32
    %c0_i32_0 = arith.constant 0 : i32
    %c0_i32_1 = arith.constant 0 : i32
    return %c0_i32, %c0_i32_0 : i32, i32
  }
  func.func @transform_3(%arg0: i32) -> (i32, i32, i32) {
    %c0_i32 = arith.constant 0 : i32
    %c0_i32_0 = arith.constant 0 : i32
    %c0_i32_1 = arith.constant 0 : i32
    return %arg0, %c0_i32, %c0_i32_0 : i32, i32, i32
  }
  func.func @transform_4(%arg0: i32) -> (i32, i32, i32) {
    %c0_i32 = arith.constant 0 : i32
    %c0_i32_0 = arith.constant 0 : i32
    %c0_i32_1 = arith.constant 0 : i32
    return %arg0, %c0_i32, %c0_i32_0 : i32, i32, i32
  }
}

</mosaic_0001>

<bundles_post_ra>
// kernel: tpu_custom_call.1
= control target key start
LH: loop header
LB: loop body
LE: loop exit
PB: predicated region body
PF: predicated region fallthrough
CT: control target
= control target key end

     0   :  { %vm84_vm0 = vcmask 31744   ;;  %s8698_s0 = inlined_call_operand.vmem [shape: f32[2,18,18,4], index: 0, kind: input, shape index: {}]   ;;  %s8699_s1 = inlined_call_operand.vmem [shape: f32[9,8,4], index: 1, kind: input, shape index: {}]   ;;  %s8700_s2 = inlined_call_operand.vmem [shape: f32[8,1], index: 2, kind: input, shape index: {}]   ;;  %s8701_s3 = inlined_call_operand.hbm [shape: f32[2,8,256], index: 3, kind: output, shape index: {0}]   ;;  %s8702_s4 = inlined_call_operand.vmem [shape: f32[2,8,2], index: 4, kind: output, shape index: {1}]  }
   0x1   :  { %v66_v0 = vld [vmem:[%s8698_s0 + $0xc1] sm:$0xff]  ;;  %v67_v1 = vld [vmem:[%s8698_s0 + $0xc9] sm:$0xff]  ;;  %v4328_v2 = vld [vmem:[%s8698_s0 + $0x271] sm:$0xff] }
   0x2   :  { %v5486_v3 = vpack.c.bf16 %v67_v1, %v66_v0  ;;  %vm6451_vm1 = vmpackc.low %vm84_vm0, %vm84_vm0  ;;  %v4329_v5 = vld [vmem:[%s8698_s0 + $0x279] sm:$0xff]  ;;  %v50_v6 = vld [vmem:[%s8698_s0 + $0x1] sm:$0xff] }
   0x3   :  { %v5918_v7 = vpack.c.bf16 %v4329_v5, %v4328_v2  ;;  %v51_v8 = vld [vmem:[%s8698_s0 + $0x9] sm:$0xff]  ;;  %v4312_v9 = vld [vmem:[%s8698_s0 + $0x1b1] sm:$0xff]  ;;  %v4313_v10 = vld [vmem:[%s8698_s0 + $0x1b9] sm:$0xff] }
   0x4   :  { %5488 = vmatprep.subr.msk.bf16.mxu0 %vm6451_vm1, %v5486_v3  ;;  %v5489_v11 = vpack.c.bf16 %v51_v8, %v50_v6  ;;  %v5921_v12 = vpack.c.bf16 %v4313_v10, %v4312_v9  ;;  %v68_v13 = vld [vmem:[%s8698_s0 + $0xd9] sm:$0xff]  ;;  %v69_v14 = vld [vmem:[%s8698_s0 + $0xe1] sm:$0xff]  ;;  %v4330_v15 = vld [vmem:[%s8698_s0 + $0x289] sm:$0xff] }
   0x5   :  { %5920 = vmatprep.subr.msk.bf16.mxu1 %vm6451_vm1, %v5918_v7  ;;  %v5492_v16 = vpack.c.bf16 %v69_v14, %v68_v13  ;;  %v4331_v17 = vld [vmem:[%s8698_s0 + $0x291] sm:$0xff]  ;;  %v52_v19 = vld [vmem:[%s8698_s0 + $0x19] sm:$0xff]  ;;  %v53_v20 = vld [vmem:[%s8698_s0 + $0x21] sm:$0xff] }
   0x6   :  { %5491 = vmatpush3.bf16.xpose.msk.msra.mxu0 %vm6451_vm1, %v5489_v11  ;;  %5923 = vmatpush3.bf16.xpose.msk.msra.mxu1 %vm6451_vm1, %v5921_v12  ;;  %v5924_v18 = vpack.c.bf16 %v4331_v17, %v4330_v15  ;;  %v4314_v21 = vld [vmem:[%s8698_s0 + $0x1c9] sm:$0xff]  ;;  %v4315_v22 = vld [vmem:[%s8698_s0 + $0x1d1] sm:$0xff]  ;;  %v71_v24 = vld [vmem:[%s8698_s0 + $0xf9] sm:$0xff]  ;;  %v5495_v27 = vpack.c.bf16 %v53_v20, %v52_v19 }
   0x7   :  { %5494 = vmatprep.subr.msk.bf16.mxu0 %vm6451_vm1, %v5492_v16  ;;  %v70_v23 = vld [vmem:[%s8698_s0 + $0xf1] sm:$0xff]  ;;  %v4332_v25 = vld [vmem:[%s8698_s0 + $0x2a1] sm:$0xff]  ;;  %v4333_v26 = vld [vmem:[%s8698_s0 + $0x2a9] sm:$0xff]  ;;  %v5927_v28 = vpack.c.bf16 %v4315_v22, %v4314_v21 }
   0x8   :  { %5926 = vmatprep.subr.msk.bf16.mxu1 %vm6451_vm1, %v5924_v18  ;;  %v5498_v29 = vpack.c.bf16 %v71_v24, %v70_v23  ;;  %v5930_v30 = vpack.c.bf16 %v4333_v26, %v4332_v25  ;;  %v54_v31 = vld [vmem:[%s8698_s0 + $0x31] sm:$0xff]  ;;  %v55_v32 = vld [vmem:[%s8698_s0 + $0x39] sm:$0xff]  ;;  %v4316_v33 = vld [vmem:[%s8698_s0 + $0x1e1] sm:$0xff] }
   0x9   :  { %v4317_v34 = vld [vmem:[%s8698_s0 + $0x1e9] sm:$0xff]  ;;  %v73_v36 = vld [vmem:[%s8698_s0 + $0x111] sm:$0xff]  ;;  %v4334_v37 = vld [vmem:[%s8698_s0 + $0x2b9] sm:$0xff]  ;;  %v5501_v39 = vpack.c.bf16 %v55_v32, %v54_v31 }
   0xa   :  { %v72_v35 = vld [vmem:[%s8698_s0 + $0x109] sm:$0xff]  ;;  %v4335_v38 = vld [vmem:[%s8698_s0 + $0x2c1] sm:$0xff]  ;;  %v5933_v40 = vpack.c.bf16 %v4317_v34, %v4316_v33  ;;  %v57_v44 = vld [vmem:[%s8698_s0 + $0x51] sm:$0xff] }
   0xb   :  { %v5504_v41 = vpack.c.bf16 %v73_v36, %v72_v35  ;;  %v5936_v42 = vpack.c.bf16 %v4335_v38, %v4334_v37  ;;  %v56_v43 = vld [vmem:[%s8698_s0 + $0x49] sm:$0xff]  ;;  %v4318_v46 = vld [vmem:[%s8698_s0 + $0x1f9] sm:$0xff]  ;;  %v4319_v47 = vld [vmem:[%s8698_s0 + $0x201] sm:$0xff] }
   0xc   :  { %v6563_v45 = vld [vmem:[%s8699_s1 + $0x8] sm:$0xff]  ;;  %v4336_v50 = vld [vmem:[%s8698_s0 + $0x2d1] sm:$0xff]  ;;  %v4337_v51 = vld [vmem:[%s8698_s0 + $0x2d9] sm:$0xff]  ;;  %v5507_v52 = vpack.c.bf16 %v57_v44, %v56_v43  ;;  %v5939_v53 = vpack.c.bf16 %v4319_v47, %v4318_v46 }
   0xd   :  { %v74_v48 = vld [vmem:[%s8698_s0 + $0x121] sm:$0xff]  ;;  %v75_v49 = vld [vmem:[%s8698_s0 + $0x129] sm:$0xff]  ;;  %4906 = vmatprep.mubr.msk.f32.mxu0 %vm84_vm0, %v6563_v45  ;;  %5212 = vmatprep.mubr.msk.f32.mxu1 %vm84_vm0, %v6563_v45  ;;  %v5942_v55 = vpack.c.bf16 %v4337_v51, %v4336_v50  ;;  %v4320_v58 = vld [vmem:[%s8698_s0 + $0x211] sm:$0xff] }
   0xe   :  { %5497 = vmatpush3.bf16.xpose.msk.msra.mxu0 %vm6451_vm1, %v5495_v27  ;;  %5929 = vmatpush3.bf16.xpose.msk.msra.mxu1 %vm6451_vm1, %v5927_v28  ;;  %v5510_v54 = vpack.c.bf16 %v75_v49, %v74_v48  ;;  %v58_v56 = vld [vmem:[%s8698_s0 + $0x61] sm:$0xff]  ;;  %v59_v57 = vld [vmem:[%s8698_s0 + $0x69] sm:$0xff]  ;;  %v4321_v59 = vld [vmem:[%s8698_s0 + $0x219] sm:$0xff] }
   0xf   :  { %5500 = vmatprep.subr.msk.bf16.mxu0 %vm6451_vm1, %v5498_v29  ;;  %5932 = vmatprep.subr.msk.bf16.mxu1 %vm6451_vm1, %v5930_v30  ;;  %v76_v60 = vld [vmem:[%s8698_s0 + $0x139] sm:$0xff]  ;;  %v77_v61 = vld [vmem:[%s8698_s0 + $0x141] sm:$0xff]  ;;  %v4338_v62 = vld [vmem:[%s8698_s0 + $0x2e9] sm:$0xff]  ;;  %v5513_v0 = vpack.c.bf16 %v59_v57, %v58_v56  ;;  %v5945_v1 = vpack.c.bf16 %v4321_v59, %v4320_v58 }
  0x10   :  { %v4339_v63 = vld [vmem:[%s8698_s0 + $0x2f1] sm:$0xff]  ;;  %v5516_v2 = vpack.c.bf16 %v77_v61, %v76_v60  ;;  %v60_v5 = vld [vmem:[%s8698_s0 + $0x79] sm:$0xff]  ;;  %v61_v6 = vld [vmem:[%s8698_s0 + $0x81] sm:$0xff] }
  0x11   :  { %v5948_v3 = vpack.c.bf16 %v4339_v63, %v4338_v62  ;;  %v4322_v7 = vld [vmem:[%s8698_s0 + $0x229] sm:$0xff]  ;;  %v4323_v8 = vld [vmem:[%s8698_s0 + $0x231] sm:$0xff]  ;;  %v79_v10 = vld [vmem:[%s8698_s0 + $0x159] sm:$0xff]  ;;  %v5519_v13 = vpack.c.bf16 %v61_v6, %v60_v5 }
  0x12   :  { %v78_v9 = vld [vmem:[%s8698_s0 + $0x151] sm:$0xff]  ;;  %v4340_v11 = vld [vmem:[%s8698_s0 + $0x301] sm:$0xff]  ;;  %v4341_v12 = vld [vmem:[%s8698_s0 + $0x309] sm:$0xff]  ;;  %v5951_v14 = vpack.c.bf16 %v4323_v8, %v4322_v7 }
  0x13   :  { %v5522_v15 = vpack.c.bf16 %v79_v10, %v78_v9  ;;  %v5954_v16 = vpack.c.bf16 %v4341_v12, %v4340_v11  ;;  %v62_v17 = vld [vmem:[%s8698_s0 + $0x91] sm:$0xff]  ;;  %v63_v18 = vld [vmem:[%s8698_s0 + $0x99] sm:$0xff]  ;;  %v4324_v19 = vld [vmem:[%s8698_s0 + $0x241] sm:$0xff] }
  0x14   :  { %v4325_v20 = vld [vmem:[%s8698_s0 + $0x249] sm:$0xff]  ;;  %v81_v22 = vld [vmem:[%s8698_s0 + $0x171] sm:$0xff]  ;;  %v4342_v23 = vld [vmem:[%s8698_s0 + $0x319] sm:$0xff]  ;;  %v5525_v25 = vpack.c.bf16 %v63_v18, %v62_v17 }
  0x15   :  { %v80_v21 = vld [vmem:[%s8698_s0 + $0x169] sm:$0xff]  ;;  %v4343_v24 = vld [vmem:[%s8698_s0 + $0x321] sm:$0xff]  ;;  %v5957_v26 = vpack.c.bf16 %v4325_v20, %v4324_v19  ;;  %v65_v30 = vld [vmem:[%s8698_s0 + $0xb1] sm:$0xff] }
  0x16   :  { %5503 = vmatpush3.bf16.xpose.msk.msra.mxu0 %vm6451_vm1, %v5501_v39  ;;  %5935 = vmatpush3.bf16.xpose.msk.msra.mxu1 %vm6451_vm1, %v5933_v40  ;;  %v5528_v27 = vpack.c.bf16 %v81_v22, %v80_v21  ;;  %v5960_v28 = vpack.c.bf16 %v4343_v24, %v4342_v23  ;;  %v64_v29 = vld [vmem:[%s8698_s0 + $0xa9] sm:$0xff]  ;;  %v4326_v31 = vld [vmem:[%s8698_s0 + $0x259] sm:$0xff]  ;;  %v4327_v32 = vld [vmem:[%s8698_s0 + $0x261] sm:$0xff] }
  0x17   :  { %5506 = vmatprep.subr.msk.bf16.mxu0 %vm6451_vm1, %v5504_v41  ;;  %5938 = vmatprep.subr.msk.bf16.mxu1 %vm6451_vm1, %v5936_v42  ;;  %v33_v33 = vld [vmem:[%s8698_s0 + $0xc0] sm:$0xff]  ;;  %v34_v34 = vld [vmem:[%s8698_s0 + $0xc8] sm:$0xff]  ;;  %v4296_v35 = vld [vmem:[%s8698_s0 + $0x270] sm:$0xff]  ;;  %v5531_v37 = vpack.c.bf16 %v65_v30, %v64_v29  ;;  %v5963_v38 = vpack.c.bf16 %v4327_v32, %v4326_v31 }
  0x18   :  { %v4297_v36 = vld [vmem:[%s8698_s0 + $0x278] sm:$0xff]  ;;  %v6719_v39 = vpack.c.bf16 %v34_v34, %v33_v33  ;;  %v17_v41 = vld [vmem:[%s8698_s0] sm:$0xff]  ;;  %v18_v42 = vld [vmem:[%s8698_s0 + $0x8] sm:$0xff] }
  0x19   :  { %v6721_v40 = vpack.c.bf16 %v4297_v36, %v4296_v35  ;;  %v4280_v43 = vld [vmem:[%s8698_s0 + $0x1b0] sm:$0xff]  ;;  %v4281_v44 = vld [vmem:[%s8698_s0 + $0x1b8] sm:$0xff]  ;;  %v36_v47 = vld [vmem:[%s8698_s0 + $0xe0] sm:$0xff]  ;;  %v5537_v50 = vpack.c.bf16 %v18_v42, %v17_v41 }
  0x1a   :  { %v35_v46 = vld [vmem:[%s8698_s0 + $0xd8] sm:$0xff]  ;;  %v4298_v48 = vld [vmem:[%s8698_s0 + $0x288] sm:$0xff]  ;;  %v4299_v49 = vld [vmem:[%s8698_s0 + $0x290] sm:$0xff]  ;;  %v5969_v51 = vpack.c.bf16 %v4281_v44, %v4280_v43 }
  0x1e   :  { %5509 = vmatpush3.bf16.xpose.msk.msra.mxu0 %vm6451_vm1, %v5507_v52  ;;  %5941 = vmatpush3.bf16.xpose.msk.msra.mxu1 %vm6451_vm1, %v5939_v53 }
  0x1f   :  { %5512 = vmatprep.subr.msk.bf16.mxu0 %vm6451_vm1, %v5510_v54  ;;  %5944 = vmatprep.subr.msk.bf16.mxu1 %vm6451_vm1, %v5942_v55 }
  0x26   :  { %5515 = vmatpush3.bf16.xpose.msk.msra.mxu0 %vm6451_vm1, %v5513_v0  ;;  %5947 = vmatpush3.bf16.xpose.msk.msra.mxu1 %vm6451_vm1, %v5945_v1 }
  0x27   :  { %5518 = vmatprep.subr.msk.bf16.mxu0 %vm6451_vm1, %v5516_v2  ;;  %5950 = vmatprep.subr.msk.bf16.mxu1 %vm6451_vm1, %v5948_v3 }
  0x2e   :  { %5521 = vmatpush3.bf16.xpose.msk.msra.mxu0 %vm6451_vm1, %v5519_v13  ;;  %5953 = vmatpush3.bf16.xpose.msk.msra.mxu1 %vm6451_vm1, %v5951_v14 }
  0x2f   :  { %5524 = vmatprep.subr.msk.bf16.mxu0 %vm6451_vm1, %v5522_v15  ;;  %5956 = vmatprep.subr.msk.bf16.mxu1 %vm6451_vm1, %v5954_v16 }
  0x36   :  { %5527 = vmatpush3.bf16.xpose.msk.msra.mxu0 %vm6451_vm1, %v5525_v25  ;;  %5959 = vmatpush3.bf16.xpose.msk.msra.mxu1 %vm6451_vm1, %v5957_v26 }
  0x37   :  { %5530 = vmatprep.subr.msk.bf16.mxu0 %vm6451_vm1, %v5528_v27  ;;  %5962 = vmatprep.subr.msk.bf16.mxu1 %vm6451_vm1, %v5960_v28 }
  0x3e   :  { %5533 = vmatpush3.bf16.xpose.msk.msra.mxu0 %vm6451_vm1, %v5531_v37  ;;  %5965 = vmatpush3.bf16.xpose.msk.msra.mxu1 %vm6451_vm1, %v5963_v38 }
  0x3f   :  { %5536 = vmatprep.subr.msk.bf16.mxu0 %vm6451_vm1, %v6719_v39  ;;  %5968 = vmatprep.subr.msk.bf16.mxu1 %vm6451_vm1, %v6721_v40 }
  0x40   :  { %10 = vsyncpa [#allocation3], 0  ;;  %v6757_v52 = vpack.c.bf16 %v36_v47, %v35_v46  ;;  %v6759_v53 = vpack.c.bf16 %v4299_v49, %v4298_v48  ;;  %v6768_v54 = vld [vmem:[%s8699_s1] sm:$0xff]  ;;  %v19_v55 = vld [vmem:[%s8698_s0 + $0x18] sm:$0xff] }
  0x41   :  { %v20_v56 = vld [vmem:[%s8698_s0 + $0x20] sm:$0xff]  ;;  %v4283_v57 = vld [vmem:[%s8698_s0 + $0x1d0] sm:$0xff]  ;;  %v38_v59 = vld [vmem:[%s8698_s0 + $0xf8] sm:$0xff] }
  0x42   :  { %v37_v58 = vld [vmem:[%s8698_s0 + $0xf0] sm:$0xff]  ;;  %v4300_v60 = vld [vmem:[%s8698_s0 + $0x2a0] sm:$0xff]  ;;  %v4301_v61 = vld [vmem:[%s8698_s0 + $0x2a8] sm:$0xff]  ;;  %v6808_v62 = vpack.c.bf16 %v20_v56, %v19_v55 }
  0x43   :  { %v6812_v0 = vpack.c.bf16 %v38_v59, %v37_v58  ;;  %v6814_v1 = vpack.c.bf16 %v4301_v61, %v4300_v60  ;;  %v21_v2 = vld [vmem:[%s8698_s0 + $0x30] sm:$0xff]  ;;  %v22_v3 = vld [vmem:[%s8698_s0 + $0x38] sm:$0xff]  ;;  %v4284_v5 = vld [vmem:[%s8698_s0 + $0x1e0] sm:$0xff] }
  0x44   :  { %v4285_v6 = vld [vmem:[%s8698_s0 + $0x1e8] sm:$0xff]  ;;  %v40_v8 = vld [vmem:[%s8698_s0 + $0x110] sm:$0xff]  ;;  %v4302_v9 = vld [vmem:[%s8698_s0 + $0x2b8] sm:$0xff]  ;;  %v6852_v11 = vpack.c.bf16 %v22_v3, %v21_v2 }
  0x45   :  { %4907 = vmatmul.mubr.msk.f32.vlgmr.msra.gmra.mrb[0].mxu0 %vm84_vm0, %v6563_v45  ;;  %5213 = vmatmul.mubr.msk.f32.vlgmr.msra.gmra.mrb[0].mxu1 %vm84_vm0, %v6563_v45  ;;  %v4282_v45 = vld [vmem:[%s8698_s0 + $0x1c8] sm:$0xff]  ;;  %v4303_v10 = vld [vmem:[%s8698_s0 + $0x2c0] sm:$0xff]  ;;  %v6854_v12 = vpack.c.bf16 %v4285_v6, %v4284_v5  ;;  %v24_v16 = vld [vmem:[%s8698_s0 + $0x50] sm:$0xff] }
  0x46   :  { %5539 = vmatpush3.bf16.xpose.msk.msra.mxu0 %vm6451_vm1, %v5537_v50  ;;  %5971 = vmatpush3.bf16.xpose.msk.msra.mxu1 %vm6451_vm1, %v5969_v51  ;;  %v6810_v63 = vpack.c.bf16 %v4283_v57, %v4282_v45  ;;  %v39_v7 = vld [vmem:[%s8698_s0 + $0x108] sm:$0xff]  ;;  %v6858_v14 = vpack.c.bf16 %v4303_v10, %v4302_v9  ;;  %v4286_v17 = vld [vmem:[%s8698_s0 + $0x1f8] sm:$0xff]  ;;  %v4287_v18 = vld [vmem:[%s8698_s0 + $0x200] sm:$0xff] }
  0x47   :  { %5542 = vmatprep.subr.msk.bf16.mxu0 %vm6451_vm1, %v6757_v52  ;;  %5974 = vmatprep.subr.msk.bf16.mxu1 %vm6451_vm1, %v6759_v53  ;;  %v6856_v13 = vpack.c.bf16 %v40_v8, %v39_v7  ;;  %v23_v15 = vld [vmem:[%s8698_s0 + $0x48] sm:$0xff]  ;;  %v41_v19 = vld [vmem:[%s8698_s0 + $0x120] sm:$0xff]  ;;  %v4304_v21 = vld [vmem:[%s8698_s0 + $0x2d0] sm:$0xff]  ;;  %v6898_v24 = vpack.c.bf16 %v4287_v18, %v4286_v17 }
  0x48   :  { %4940 = vmatprep.mubr.msk.f32.mxu0 %vm84_vm0, %v6768_v54  ;;  %5246 = vmatprep.mubr.msk.f32.mxu1 %vm84_vm0, %v6768_v54  ;;  %v42_v20 = vld [vmem:[%s8698_s0 + $0x128] sm:$0xff]  ;;  %v4305_v22 = vld [vmem:[%s8698_s0 + $0x2d8] sm:$0xff]  ;;  %v6896_v23 = vpack.c.bf16 %v24_v16, %v23_v15  ;;  %v25_v27 = vld [vmem:[%s8698_s0 + $0x60] sm:$0xff] }
  0x49   :  { %v6900_v25 = vpack.c.bf16 %v42_v20, %v41_v19  ;;  %v6902_v26 = vpack.c.bf16 %v4305_v22, %v4304_v21  ;;  %v26_v28 = vld [vmem:[%s8698_s0 + $0x68] sm:$0xff]  ;;  %v4288_v29 = vld [vmem:[%s8698_s0 + $0x210] sm:$0xff]  ;;  %v4289_v30 = vld [vmem:[%s8698_s0 + $0x218] sm:$0xff] }
  0x4a   :  { %v43_v31 = vld [vmem:[%s8698_s0 + $0x138] sm:$0xff]  ;;  %v44_v32 = vld [vmem:[%s8698_s0 + $0x140] sm:$0xff]  ;;  %v4306_v33 = vld [vmem:[%s8698_s0 + $0x2e8] sm:$0xff]  ;;  %v6940_v35 = vpack.c.bf16 %v26_v28, %v25_v27  ;;  %v6942_v36 = vpack.c.bf16 %v4289_v30, %v4288_v29 }
  0x4b   :  { %v4307_v34 = vld [vmem:[%s8698_s0 + $0x2f0] sm:$0xff]  ;;  %v6944_v37 = vpack.c.bf16 %v44_v32, %v43_v31  ;;  %v27_v41 = vld [vmem:[%s8698_s0 + $0x78] sm:$0xff]  ;;  %v28_v42 = vld [vmem:[%s8698_s0 + $0x80] sm:$0xff] }
  0x4c   :  { %v6946_v38 = vpack.c.bf16 %v4307_v34, %v4306_v33  ;;  %v4290_v43 = vld [vmem:[%s8698_s0 + $0x228] sm:$0xff]  ;;  %v4291_v44 = vld [vmem:[%s8698_s0 + $0x230] sm:$0xff]  ;;  %v46_v47 = vld [vmem:[%s8698_s0 + $0x158] sm:$0xff]  ;;  %v6984_v50 = vpack.c.bf16 %v28_v42, %v27_v41 }
  0x4d   :  { %v45_v46 = vld [vmem:[%s8698_s0 + $0x150] sm:$0xff]  ;;  %v4308_v48 = vld [vmem:[%s8698_s0 + $0x300] sm:$0xff]  ;;  %v4309_v49 = vld [vmem:[%s8698_s0 + $0x308] sm:$0xff]  ;;  %v6986_v51 = vpack.c.bf16 %v4291_v44, %v4290_v43 }
  0x4e   :  { %5545 = vmatpush3.bf16.xpose.msk.msra.mxu0 %vm6451_vm1, %v6808_v62  ;;  %5977 = vmatpush3.bf16.xpose.msk.msra.mxu1 %vm6451_vm1, %v6810_v63  ;;  %v6988_v55 = vpack.c.bf16 %v46_v47, %v45_v46  ;;  %v6990_v56 = vpack.c.bf16 %v4309_v49, %v4308_v48  ;;  %v29_v45 = vld [vmem:[%s8698_s0 + $0x90] sm:$0xff]  ;;  %v30_v57 = vld [vmem:[%s8698_s0 + $0x98] sm:$0xff]  ;;  %v4292_v58 = vld [vmem:[%s8698_s0 + $0x240] sm:$0xff] }
  0x4f   :  { %5548 = vmatprep.subr.msk.bf16.mxu0 %vm6451_vm1, %v6812_v0  ;;  %5980 = vmatprep.subr.msk.bf16.mxu1 %vm6451_vm1, %v6814_v1  ;;  %v4293_v59 = vld [vmem:[%s8698_s0 + $0x248] sm:$0xff]  ;;  %v48_v61 = vld [vmem:[%s8698_s0 + $0x170] sm:$0xff]  ;;  %v4310_v2 = vld [vmem:[%s8698_s0 + $0x318] sm:$0xff]  ;;  %v7028_v5 = vpack.c.bf16 %v30_v57, %v29_v45 }
  0x50   :  { %v47_v60 = vld [vmem:[%s8698_s0 + $0x168] sm:$0xff]  ;;  %v4311_v3 = vld [vmem:[%s8698_s0 + $0x320] sm:$0xff]  ;;  %v7030_v6 = vpack.c.bf16 %v4293_v59, %v4292_v58  ;;  %v32_v10 = vld [vmem:[%s8698_s0 + $0xb0] sm:$0xff] }
  0x51   :  { %v7032_v7 = vpack.c.bf16 %v48_v61, %v47_v60  ;;  %v7034_v8 = vpack.c.bf16 %v4311_v3, %v4310_v2  ;;  %v31_v9 = vld [vmem:[%s8698_s0 + $0xa8] sm:$0xff]  ;;  %v4294_v15 = vld [vmem:[%s8698_s0 + $0x258] sm:$0xff]  ;;  %v4295_v16 = vld [vmem:[%s8698_s0 + $0x260] sm:$0xff] }
  0x52   :  { %v441_v17 = vld [vmem:[%s8698_s0 + $0xc2] sm:$0xff]  ;;  %v442_v18 = vld [vmem:[%s8698_s0 + $0xca] sm:$0xff]  ;;  %v4427_v19 = vld [vmem:[%s8698_s0 + $0x272] sm:$0xff]  ;;  %v7072_v21 = vpack.c.bf16 %v32_v10, %v31_v9  ;;  %v7074_v22 = vpack.c.bf16 %v4295_v16, %v4294_v15 }
  0x53   :  { %v4428_v20 = vld [vmem:[%s8698_s0 + $0x27a] sm:$0xff]  ;;  %v5582_v27 = vpack.c.bf16 %v442_v18, %v441_v17  ;;  %v425_v29 = vld [vmem:[%s8698_s0 + $0x2] sm:$0xff]  ;;  %v426_v30 = vld [vmem:[%s8698_s0 + $0xa] sm:$0xff] }
  0x54   :  { %v6014_v28 = vpack.c.bf16 %v4428_v20, %v4427_v19  ;;  %v4411_v31 = vld [vmem:[%s8698_s0 + $0x1b2] sm:$0xff]  ;;  %v4412_v32 = vld [vmem:[%s8698_s0 + $0x1ba] sm:$0xff]  ;;  %v444_v34 = vld [vmem:[%s8698_s0 + $0xe2] sm:$0xff]  ;;  %v5585_v43 = vpack.c.bf16 %v426_v30, %v425_v29 }
  0x55   :  { %v443_v33 = vld [vmem:[%s8698_s0 + $0xda] sm:$0xff]  ;;  %v4429_v41 = vld [vmem:[%s8698_s0 + $0x28a] sm:$0xff]  ;;  %v4430_v42 = vld [vmem:[%s8698_s0 + $0x292] sm:$0xff]  ;;  %v6017_v44 = vpack.c.bf16 %v4412_v32, %v4411_v31 }
  0x56   :  { %5551 = vmatpush3.bf16.xpose.msk.msra.mxu0 %vm6451_vm1, %v6852_v11  ;;  %5983 = vmatpush3.bf16.xpose.msk.msra.mxu1 %vm6451_vm1, %v6854_v12  ;;  %v7110_v46 = vpack.c.bf16 %v444_v34, %v443_v33  ;;  %v7112_v47 = vpack.c.bf16 %v4430_v42, %v4429_v41  ;;  %v7121_v48 = vld [vmem:[%s8699_s1 + $0x10] sm:$0xff]  ;;  %v427_v49 = vld [vmem:[%s8698_s0 + $0x1a] sm:$0xff]  ;;  %v428_v45 = vld [vmem:[%s8698_s0 + $0x22] sm:$0xff] }
  0x57   :  { %5554 = vmatprep.subr.msk.bf16.mxu0 %vm6451_vm1, %v6856_v13  ;;  %5986 = vmatprep.subr.msk.bf16.mxu1 %vm6451_vm1, %v6858_v14  ;;  %v4414_v57 = vld [vmem:[%s8698_s0 + $0x1d2] sm:$0xff]  ;;  %v446_v59 = vld [vmem:[%s8698_s0 + $0xfa] sm:$0xff]  ;;  %v4431_v60 = vld [vmem:[%s8698_s0 + $0x2a2] sm:$0xff]  ;;  %v7161_v2 = vpack.c.bf16 %v428_v45, %v427_v49 }
  0x58   :  { %v445_v58 = vld [vmem:[%s8698_s0 + $0xf2] sm:$0xff]  ;;  %v4432_v61 = vld [vmem:[%s8698_s0 + $0x2aa] sm:$0xff]  ;;  %v430_v16 = vld [vmem:[%s8698_s0 + $0x3a] sm:$0xff] }
  0x59   :  { %v7165_v9 = vpack.c.bf16 %v446_v59, %v445_v58  ;;  %v7167_v10 = vpack.c.bf16 %v4432_v61, %v4431_v60  ;;  %v429_v15 = vld [vmem:[%s8698_s0 + $0x32] sm:$0xff]  ;;  %v4415_v17 = vld [vmem:[%s8698_s0 + $0x1e2] sm:$0xff]  ;;  %v4416_v18 = vld [vmem:[%s8698_s0 + $0x1ea] sm:$0xff] }
  0x5a   :  { %v447_v19 = vld [vmem:[%s8698_s0 + $0x10a] sm:$0xff]  ;;  %v448_v20 = vld [vmem:[%s8698_s0 + $0x112] sm:$0xff]  ;;  %v7205_v29 = vpack.c.bf16 %v430_v16, %v429_v15  ;;  %v7207_v30 = vpack.c.bf16 %v4416_v18, %v4415_v17  ;;  %v4417_v41 = vld [vmem:[%s8698_s0 + $0x1fa] sm:$0xff] }
  0x5b   :  { %v7209_v31 = vpack.c.bf16 %v448_v20, %v447_v19  ;;  %v431_v33 = vld [vmem:[%s8698_s0 + $0x4a] sm:$0xff]  ;;  %v432_v34 = vld [vmem:[%s8698_s0 + $0x52] sm:$0xff]  ;;  %v4418_v42 = vld [vmem:[%s8698_s0 + $0x202] sm:$0xff] }
  0x5c   :  { %v4435_v49 = vld [vmem:[%s8698_s0 + $0x2d2] sm:$0xff]  ;;  %v4436_v45 = vld [vmem:[%s8698_s0 + $0x2da] sm:$0xff]  ;;  %v433_v60 = vld [vmem:[%s8698_s0 + $0x62] sm:$0xff] }
  0x5d   :  { %v7255_v59 = vpack.c.bf16 %v4436_v45, %v4435_v49  ;;  %v434_v61 = vld [vmem:[%s8698_s0 + $0x6a] sm:$0xff]  ;;  %v4419_v15 = vld [vmem:[%s8698_s0 + $0x212] sm:$0xff]  ;;  %v4420_v16 = vld [vmem:[%s8698_s0 + $0x21a] sm:$0xff] }
  0x5e   :  { %5557 = vmatpush3.bf16.xpose.msk.msra.mxu0 %vm6451_vm1, %v6896_v23  ;;  %5989 = vmatpush3.bf16.xpose.msk.msra.mxu1 %vm6451_vm1, %v6898_v24  ;;  %v451_v17 = vld [vmem:[%s8698_s0 + $0x13a] sm:$0xff]  ;;  %v452_v18 = vld [vmem:[%s8698_s0 + $0x142] sm:$0xff]  ;;  %v4437_v19 = vld [vmem:[%s8698_s0 + $0x2ea] sm:$0xff] }
  0x5f   :  { %5560 = vmatprep.subr.msk.bf16.mxu0 %vm6451_vm1, %v6900_v25  ;;  %5992 = vmatprep.subr.msk.bf16.mxu1 %vm6451_vm1, %v6902_v26  ;;  %v4438_v20 = vld [vmem:[%s8698_s0 + $0x2f2] sm:$0xff]  ;;  %v454_v45 = vld [vmem:[%s8698_s0 + $0x15a] sm:$0xff] }
  0x60   :  { %v453_v49 = vld [vmem:[%s8698_s0 + $0x152] sm:$0xff] }
  0x66   :  { %5563 = vmatpush3.bf16.xpose.msk.msra.mxu0 %vm6451_vm1, %v6940_v35  ;;  %5995 = vmatpush3.bf16.xpose.msk.msra.mxu1 %vm6451_vm1, %v6942_v36 }
  0x67   :  { %5566 = vmatprep.subr.msk.bf16.mxu0 %vm6451_vm1, %v6944_v37  ;;  %5998 = vmatprep.subr.msk.bf16.mxu1 %vm6451_vm1, %v6946_v38 }
  0x6e   :  { %5569 = vmatpush3.bf16.xpose.msk.msra.mxu0 %vm6451_vm1, %v6984_v50  ;;  %6001 = vmatpush3.bf16.xpose.msk.msra.mxu1 %vm6451_vm1, %v6986_v51 }
  0x6f   :  { %5572 = vmatprep.subr.msk.bf16.mxu0 %vm6451_vm1, %v6988_v55  ;;  %6004 = vmatprep.subr.msk.bf16.mxu1 %vm6451_vm1, %v6990_v56 }
  0x76   :  { %5575 = vmatpush3.bf16.xpose.msk.msra.mxu0 %vm6451_vm1, %v7028_v5  ;;  %6007 = vmatpush3.bf16.xpose.msk.msra.mxu1 %vm6451_vm1, %v7030_v6 }
  0x77   :  { %5578 = vmatprep.subr.msk.bf16.mxu0 %vm6451_vm1, %v7032_v7  ;;  %6010 = vmatprep.subr.msk.bf16.mxu1 %vm6451_vm1, %v7034_v8 }
  0x7e   :  { %5581 = vmatpush3.bf16.xpose.msk.msra.mxu0 %vm6451_vm1, %v7072_v21  ;;  %6013 = vmatpush3.bf16.xpose.msk.msra.mxu1 %vm6451_vm1, %v7074_v22 }
  0x7f   :  { %5584 = vmatprep.subr.msk.bf16.mxu0 %vm6451_vm1, %v5582_v27  ;;  %6016 = vmatprep.subr.msk.bf16.mxu1 %vm6451_vm1, %v6014_v28  ;;  %v4433_v27 = vld [vmem:[%s8698_s0 + $0x2ba] sm:$0xff]  ;;  %v4434_v28 = vld [vmem:[%s8698_s0 + $0x2c2] sm:$0xff] }
  0x80   :  { %v7211_v32 = vpack.c.bf16 %v4434_v28, %v4433_v27  ;;  %v7293_v27 = vpack.c.bf16 %v434_v61, %v433_v60  ;;  %v7295_v28 = vpack.c.bf16 %v4420_v16, %v4419_v15  ;;  %v4439_v60 = vld [vmem:[%s8698_s0 + $0x302] sm:$0xff]  ;;  %v4440_v61 = vld [vmem:[%s8698_s0 + $0x30a] sm:$0xff] }
  0x85   :  { %4941 = vmatmul.mubr.msk.f32.vlgmr.msra.gmra.mrb[0].mxu0 %vm84_vm0, %v6768_v54  ;;  %5247 = vmatmul.mubr.msk.f32.vlgmr.msra.gmra.mrb[0].mxu1 %vm84_vm0, %v6768_v54  ;;  %v4413_v54 = vld [vmem:[%s8698_s0 + $0x1ca] sm:$0xff] }
  0x86   :  { %5587 = vmatpush3.bf16.xpose.msk.msra.mxu0 %vm6451_vm1, %v5585_v43  ;;  %6019 = vmatpush3.bf16.xpose.msk.msra.mxu1 %vm6451_vm1, %v6017_v44  ;;  %v7163_v3 = vpack.c.bf16 %v4414_v57, %v4413_v54  ;;  %v449_v43 = vld [vmem:[%s8698_s0 + $0x122] sm:$0xff]  ;;  %v450_v44 = vld [vmem:[%s8698_s0 + $0x12a] sm:$0xff]  ;;  %v7249_v54 = vpack.c.bf16 %v432_v34, %v431_v33  ;;  %v7251_v57 = vpack.c.bf16 %v4418_v42, %v4417_v41  ;;  %v435_v41 = vld [vmem:[%s8698_s0 + $0x7a] sm:$0xff] }
  0x87   :  { %5590 = vmatprep.subr.msk.bf16.mxu0 %vm6451_vm1, %v7110_v46  ;;  %6022 = vmatprep.subr.msk.bf16.mxu1 %vm6451_vm1, %v7112_v47  ;;  %v7253_v58 = vpack.c.bf16 %v450_v44, %v449_v43  ;;  %v7297_v33 = vpack.c.bf16 %v452_v18, %v451_v17  ;;  %v7299_v34 = vpack.c.bf16 %v4438_v20, %v4437_v19  ;;  %v436_v42 = vld [vmem:[%s8698_s0 + $0x82] sm:$0xff]  ;;  %v4421_v43 = vld [vmem:[%s8698_s0 + $0x22a] sm:$0xff]  ;;  %v4422_v44 = vld [vmem:[%s8698_s0 + $0x232] sm:$0xff] }
  0x88   :  { %4974 = vmatprep.mubr.msk.f32.mxu0 %vm84_vm0, %v7121_v48  ;;  %5280 = vmatprep.mubr.msk.f32.mxu1 %vm84_vm0, %v7121_v48  ;;  %v7337_v15 = vpack.c.bf16 %v436_v42, %v435_v41  ;;  %v7339_v16 = vpack.c.bf16 %v4422_v44, %v4421_v43  ;;  %v7341_v17 = vpack.c.bf16 %v454_v45, %v453_v49  ;;  %v437_v19 = vld [vmem:[%s8698_s0 + $0x92] sm:$0xff]  ;;  %v438_v20 = vld [vmem:[%s8698_s0 + $0x9a] sm:$0xff]  ;;  %v4423_v41 = vld [vmem:[%s8698_s0 + $0x242] sm:$0xff] }
  0x89   :  { %v7343_v18 = vpack.c.bf16 %v4440_v61, %v4439_v60  ;;  %v4424_v42 = vld [vmem:[%s8698_s0 + $0x24a] sm:$0xff]  ;;  %v456_v44 = vld [vmem:[%s8698_s0 + $0x172] sm:$0xff]  ;;  %v4441_v49 = vld [vmem:[%s8698_s0 + $0x31a] sm:$0xff]  ;;  %v7381_v60 = vpack.c.bf16 %v438_v20, %v437_v19 }
  0x8a   :  { %8708 = vst [vmem:[#allocation5_spill] sm:$0xff] %v7339_v16  ;;  %8709 = vst [vmem:[#allocation6_spill] sm:$0xff] %v7341_v17  ;;  %v455_v43 = vld [vmem:[%s8698_s0 + $0x16a] sm:$0xff]  ;;  %v4442_v45 = vld [vmem:[%s8698_s0 + $0x322] sm:$0xff]  ;;  %v7383_v61 = vpack.c.bf16 %v4424_v42, %v4423_v41 }
  0x8b   :  { %8710 = vst [vmem:[#allocation7_spill] sm:$0xff] %v7343_v18  ;;  %v440_v19 = vld [vmem:[%s8698_s0 + $0xb2] sm:$0xff]  ;;  %v4425_v20 = vld [vmem:[%s8698_s0 + $0x25a] sm:$0xff]  ;;  %v4426_v41 = vld [vmem:[%s8698_s0 + $0x262] sm:$0xff] }
  0x8e   :  { %5593 = vmatpush3.bf16.xpose.msk.msra.mxu0 %vm6451_vm1, %v7161_v2  ;;  %6025 = vmatpush3.bf16.xpose.msk.msra.mxu1 %vm6451_vm1, %v7163_v3 }
  0x8f   :  { %5596 = vmatprep.subr.msk.bf16.mxu0 %vm6451_vm1, %v7165_v9  ;;  %6028 = vmatprep.subr.msk.bf16.mxu1 %vm6451_vm1, %v7167_v10 }
  0x96   :  { %5599 = vmatpush3.bf16.xpose.msk.msra.mxu0 %vm6451_vm1, %v7205_v29  ;;  %6031 = vmatpush3.bf16.xpose.msk.msra.mxu1 %vm6451_vm1, %v7207_v30 }
  0x97   :  { %5602 = vmatprep.subr.msk.bf16.mxu0 %vm6451_vm1, %v7209_v31  ;;  %6034 = vmatprep.subr.msk.bf16.mxu1 %vm6451_vm1, %v7211_v32 }
  0x9e   :  { %5605 = vmatpush3.bf16.xpose.msk.msra.mxu0 %vm6451_vm1, %v7249_v54  ;;  %6037 = vmatpush3.bf16.xpose.msk.msra.mxu1 %vm6451_vm1, %v7251_v57 }
  0x9f   :  { %5608 = vmatprep.subr.msk.bf16.mxu0 %vm6451_vm1, %v7253_v58  ;;  %6040 = vmatprep.subr.msk.bf16.mxu1 %vm6451_vm1, %v7255_v59 }
  0xa6   :  { %5611 = vmatpush3.bf16.xpose.msk.msra.mxu0 %vm6451_vm1, %v7293_v27  ;;  %6043 = vmatpush3.bf16.xpose.msk.msra.mxu1 %vm6451_vm1, %v7295_v28 }
  0xa7   :  { %5614 = vmatprep.subr.msk.bf16.mxu0 %vm6451_vm1, %v7297_v33  ;;  %6046 = vmatprep.subr.msk.bf16.mxu1 %vm6451_vm1, %v7299_v34 }
  0xae   :  { %5617 = vmatpush3.bf16.xpose.msk.msra.mxu0 %vm6451_vm1, %v7337_v15  ;;  %6049 = vmatpush3.bf16.xpose.msk.msra.mxu1 %vm6451_vm1, %v7339_v16  ;;  %v439_v16 = vld [vmem:[%s8698_s0 + $0xaa] sm:$0xff] }
  0xaf   :  { %5620 = vmatprep.subr.msk.bf16.mxu0 %vm6451_vm1, %v7341_v17  ;;  %6052 = vmatprep.subr.msk.bf16.mxu1 %vm6451_vm1, %v7343_v18  ;;  %v7385_v18 = vpack.c.bf16 %v456_v44, %v455_v43  ;;  %v7387_v17 = vpack.c.bf16 %v4442_v45, %v4441_v49  ;;  %v7413_v42 = vpack.c.bf16 %v440_v19, %v439_v16  ;;  %v3916_v16 = vld [vmem:[%s8699_s1 + $0x18] sm:$0xff]  ;;  %v4564_v49 = vld [vmem:[%s8698_s0 + $0x2c1] sm:$0xff] }
  0xb0   :  { %v7415_v43 = vpack.c.bf16 %v4426_v41, %v4425_v20  ;;  %v4563_v44 = vld [vmem:[%s8698_s0 + $0x2b9] sm:$0xff] }
  0xb1   :  { %v7639_v41 = vpack.c.bf16 %v4564_v49, %v4563_v44  ;;  %v4552_v44 = vld [vmem:[%s8698_s0 + $0x231] sm:$0xff] }
  0xb2   :  { %v3976_v49 = vld [vmem:[%s8698_s0 + $0x151] sm:$0xff] }
  0xb6   :  { %5623 = vmatpush3.bf16.xpose.msk.msra.mxu0 %vm6451_vm1, %v7381_v60  ;;  %6055 = vmatpush3.bf16.xpose.msk.msra.mxu1 %vm6451_vm1, %v7383_v61 }
  0xb7   :  { %5626 = vmatprep.subr.msk.bf16.mxu0 %vm6451_vm1, %v7385_v18  ;;  %6058 = vmatprep.subr.msk.bf16.mxu1 %vm6451_vm1, %v7387_v17 }
  0xbe   :  { %5629 = vmatpush3.bf16.xpose.msk.msra.mxu0 %vm6451_vm1, %v7413_v42  ;;  %6061 = vmatpush3.bf16.xpose.msk.msra.mxu1 %vm6451_vm1, %v7415_v43 }
  0xbf   :  { %5632 = vmatprep.subr.msk.bf16.mxu0 %vm6451_vm1, %v6757_v52  ;;  %6064 = vmatprep.subr.msk.bf16.mxu1 %vm6451_vm1, %v6759_v53  ;;  %v3914_v52 = vld [vmem:[%s8698_s0 + $0x180] sm:$0xff]  ;;  %v3915_v53 = vld [vmem:[%s8698_s0 + $0x188] sm:$0xff] }
  0xc5   :  { %4975 = vmatmul.mubr.msk.f32.vlgmr.msra.gmra.mrb[0].mxu0 %vm84_vm0, %v7121_v48  ;;  %5281 = vmatmul.mubr.msk.f32.vlgmr.msra.gmra.mrb[0].mxu1 %vm84_vm0, %v7121_v48  ;;  %v3971_v48 = vld [vmem:[%s8698_s0 + $0x111] sm:$0xff] }
  0xc6   :  { %5635 = vmatpush3.bf16.xpose.msk.msra.mxu0 %vm6451_vm1, %v6808_v62  ;;  %6067 = vmatpush3.bf16.xpose.msk.msra.mxu1 %vm6451_vm1, %v6810_v63  ;;  %v4507_v62 = vld [vmem:[%s8698_s0 + $0x330] sm:$0xff]  ;;  %v4508_v63 = vld [vmem:[%s8698_s0 + $0x338] sm:$0xff] }
  0xc7   :  { %5638 = vmatprep.subr.msk.bf16.mxu0 %vm6451_vm1, %v6812_v0  ;;  %6070 = vmatprep.subr.msk.bf16.mxu1 %vm6451_vm1, %v6814_v1  ;;  %v7522_v0 = vpack.c.bf16 %v3915_v53, %v3914_v52  ;;  %v7524_v1 = vpack.c.bf16 %v4508_v63, %v4507_v62  ;;  %v3955_v52 = vld [vmem:[%s8698_s0 + $0x51] sm:$0xff]  ;;  %v4547_v53 = vld [vmem:[%s8698_s0 + $0x1f9] sm:$0xff]  ;;  %v4548_v62 = vld [vmem:[%s8698_s0 + $0x201] sm:$0xff] }
  0xc8   :  { %5008 = vmatprep.mubr.msk.f32.mxu0 %vm84_vm0, %v3916_v16  ;;  %5314 = vmatprep.mubr.msk.f32.mxu1 %vm84_vm0, %v3916_v16  ;;  %v3972_v63 = vld [vmem:[%s8698_s0 + $0x121] sm:$0xff] }
  0xce   :  { %5641 = vmatpush3.bf16.xpose.msk.msra.mxu0 %vm6451_vm1, %v6852_v11  ;;  %6073 = vmatpush3.bf16.xpose.msk.msra.mxu1 %vm6451_vm1, %v6854_v12  ;;  %v3966_v11 = vld [vmem:[%s8698_s0 + $0xd9] sm:$0xff]  ;;  %v3967_v12 = vld [vmem:[%s8698_s0 + $0xe1] sm:$0xff] }
  0xcf   :  { %5644 = vmatprep.subr.msk.bf16.mxu0 %vm6451_vm1, %v6856_v13  ;;  %6076 = vmatprep.subr.msk.bf16.mxu1 %vm6451_vm1, %v6858_v14  ;;  %v4559_v13 = vld [vmem:[%s8698_s0 + $0x289] sm:$0xff]  ;;  %v4560_v14 = vld [vmem:[%s8698_s0 + $0x291] sm:$0xff] }
  0xd6   :  { %5647 = vmatpush3.bf16.xpose.msk.msra.mxu0 %vm6451_vm1, %v6896_v23  ;;  %6079 = vmatpush3.bf16.xpose.msk.msra.mxu1 %vm6451_vm1, %v6898_v24  ;;  %v5678_v23 = vpack.c.bf16 %v3967_v12, %v3966_v11  ;;  %v6110_v24 = vpack.c.bf16 %v4560_v14, %v4559_v13  ;;  %v3973_v11 = vld [vmem:[%s8698_s0 + $0x129] sm:$0xff]  ;;  %v4565_v12 = vld [vmem:[%s8698_s0 + $0x2d1] sm:$0xff]  ;;  %v4566_v13 = vld [vmem:[%s8698_s0 + $0x2d9] sm:$0xff] }
  0xd7   :  { %5650 = vmatprep.subr.msk.bf16.mxu0 %vm6451_vm1, %v6900_v25  ;;  %6082 = vmatprep.subr.msk.bf16.mxu1 %vm6451_vm1, %v6902_v26  ;;  %v3950_v25 = vld [vmem:[%s8698_s0 + $0x19] sm:$0xff]  ;;  %v3951_v26 = vld [vmem:[%s8698_s0 + $0x21] sm:$0xff] }
  0xde   :  { %5653 = vmatpush3.bf16.xpose.msk.msra.mxu0 %vm6451_vm1, %v6940_v35  ;;  %6085 = vmatpush3.bf16.xpose.msk.msra.mxu1 %vm6451_vm1, %v6942_v36  ;;  %v3968_v35 = vld [vmem:[%s8698_s0 + $0xf1] sm:$0xff]  ;;  %v3969_v36 = vld [vmem:[%s8698_s0 + $0xf9] sm:$0xff] }
  0xdf   :  { %5656 = vmatprep.subr.msk.bf16.mxu0 %vm6451_vm1, %v6944_v37  ;;  %6088 = vmatprep.subr.msk.bf16.mxu1 %vm6451_vm1, %v6946_v38  ;;  %v4561_v37 = vld [vmem:[%s8698_s0 + $0x2a1] sm:$0xff]  ;;  %v4562_v38 = vld [vmem:[%s8698_s0 + $0x2a9] sm:$0xff] }
  0xe6   :  { %5659 = vmatpush3.bf16.xpose.msk.msra.mxu0 %vm6451_vm1, %v6984_v50  ;;  %6091 = vmatpush3.bf16.xpose.msk.msra.mxu1 %vm6451_vm1, %v6986_v51  ;;  %v5681_v50 = vpack.c.bf16 %v3951_v26, %v3950_v25  ;;  %v7683_v25 = vpack.c.bf16 %v4566_v13, %v4565_v12  ;;  %v3956_v26 = vld [vmem:[%s8698_s0 + $0x61] sm:$0xff]  ;;  %v3960_v13 = vld [vmem:[%s8698_s0 + $0x91] sm:$0xff] }
  0xe7   :  { %5662 = vmatprep.subr.msk.bf16.mxu0 %vm6451_vm1, %v6988_v55  ;;  %6094 = vmatprep.subr.msk.bf16.mxu1 %vm6451_vm1, %v6990_v56  ;;  %v7584_v55 = vpack.c.bf16 %v3969_v36, %v3968_v35  ;;  %v7586_v56 = vpack.c.bf16 %v4562_v38, %v4561_v37  ;;  %v4550_v35 = vld [vmem:[%s8698_s0 + $0x219] sm:$0xff]  ;;  %v3975_v37 = vld [vmem:[%s8698_s0 + $0x141] sm:$0xff]  ;;  %v4567_v38 = vld [vmem:[%s8698_s0 + $0x2e9] sm:$0xff] }
  0xe8   :  { %v3974_v36 = vld [vmem:[%s8698_s0 + $0x139] sm:$0xff] }
  0xee   :  { %5665 = vmatpush3.bf16.xpose.msk.msra.mxu0 %vm6451_vm1, %v7028_v5  ;;  %6097 = vmatpush3.bf16.xpose.msk.msra.mxu1 %vm6451_vm1, %v7030_v6  ;;  %v7593_v5 = vld [vmem:[%s8699_s1 + $0x20] sm:$0xff]  ;;  %v3952_v6 = vld [vmem:[%s8698_s0 + $0x31] sm:$0xff] }
  0xef   :  { %5668 = vmatprep.subr.msk.bf16.mxu0 %vm6451_vm1, %v7032_v7  ;;  %6100 = vmatprep.subr.msk.bf16.mxu1 %vm6451_vm1, %v7034_v8  ;;  %v3953_v7 = vld [vmem:[%s8698_s0 + $0x39] sm:$0xff]  ;;  %v4545_v8 = vld [vmem:[%s8698_s0 + $0x1e1] sm:$0xff] }
  0xf0   :  { %v7633_v45 = vpack.c.bf16 %v3953_v7, %v3952_v6  ;;  %v7725_v7 = vpack.c.bf16 %v3975_v37, %v3974_v36  ;;  %v3979_v36 = vld [vmem:[%s8698_s0 + $0x171] sm:$0xff]  ;;  %v4571_v37 = vld [vmem:[%s8698_s0 + $0x319] sm:$0xff] }
  0xf6   :  { %5671 = vmatpush3.bf16.xpose.msk.msra.mxu0 %vm6451_vm1, %v7072_v21  ;;  %6103 = vmatpush3.bf16.xpose.msk.msra.mxu1 %vm6451_vm1, %v7074_v22  ;;  %v4546_v21 = vld [vmem:[%s8698_s0 + $0x1e9] sm:$0xff] }
  0xf7   :  { %5674 = vmatprep.subr.msk.bf16.mxu0 %vm6451_vm1, %v7522_v0  ;;  %6106 = vmatprep.subr.msk.bf16.mxu1 %vm6451_vm1, %v7524_v1  ;;  %v3970_v22 = vld [vmem:[%s8698_s0 + $0x109] sm:$0xff]  ;;  %v7635_v19 = vpack.c.bf16 %v4546_v21, %v4545_v8  ;;  %v3958_v21 = vld [vmem:[%s8698_s0 + $0x79] sm:$0xff] }
  0xf8   :  { %v7637_v20 = vpack.c.bf16 %v3971_v48, %v3970_v22  ;;  %v3959_v22 = vld [vmem:[%s8698_s0 + $0x81] sm:$0xff]  ;;  %v4551_v48 = vld [vmem:[%s8698_s0 + $0x229] sm:$0xff] }
  0xfe   :  { %5677 = vmatpush3.bf16.xpose.msk.msra.mxu0 %vm6451_vm1, %v6719_v39  ;;  %6109 = vmatpush3.bf16.xpose.msk.msra.mxu1 %vm6451_vm1, %v6721_v40  ;;  %v4543_v39 = vld [vmem:[%s8698_s0 + $0x1c9] sm:$0xff]  ;;  %v4544_v40 = vld [vmem:[%s8698_s0 + $0x1d1] sm:$0xff] }
  0xff   :  { %5680 = vmatprep.subr.msk.bf16.mxu0 %vm6451_vm1, %v5678_v23  ;;  %6112 = vmatprep.subr.msk.bf16.mxu1 %vm6451_vm1, %v6110_v24  ;;  %v6113_v51 = vpack.c.bf16 %v4544_v40, %v4543_v39  ;;  %v7679_v23 = vpack.c.bf16 %v4548_v62, %v4547_v53  ;;  %v7681_v24 = vpack.c.bf16 %v3973_v11, %v3972_v63  ;;  %v3957_v39 = vld [vmem:[%s8698_s0 + $0x69] sm:$0xff]  ;;  %v4549_v40 = vld [vmem:[%s8698_s0 + $0x211] sm:$0xff] }
 0x100   :  { %v7723_v6 = vpack.c.bf16 %v4550_v35, %v4549_v40  ;;  %v4570_v53 = vld [vmem:[%s8698_s0 + $0x309] sm:$0xff]  ;;  %v7765_v62 = vpack.c.bf16 %v3959_v22, %v3958_v21  ;;  %v7767_v63 = vpack.c.bf16 %v4552_v44, %v4551_v48 }
 0x101   :  { %v4554_v40 = vld [vmem:[%s8698_s0 + $0x249] sm:$0xff] }
 0x102   :  { %v3978_v35 = vld [vmem:[%s8698_s0 + $0x169] sm:$0xff] }
 0x103   :  { %v7813_v22 = vpack.c.bf16 %v3979_v36, %v3978_v35  ;;  %v3962_v44 = vld [vmem:[%s8698_s0 + $0xa9] sm:$0xff] }
 0x105   :  { %5009 = vmatmul.mubr.msk.f32.vlgmr.msra.gmra.mrb[0].mxu0 %vm84_vm0, %v3916_v16  ;;  %5315 = vmatmul.mubr.msk.f32.vlgmr.msra.gmra.mrb[0].mxu1 %vm84_vm0, %v3916_v16  ;;  %v3954_v16 = vld [vmem:[%s8698_s0 + $0x49] sm:$0xff] }
 0x106   :  { %5683 = vmatpush3.bf16.xpose.msk.msra.mxu0 %vm6451_vm1, %v5681_v50  ;;  %6115 = vmatpush3.bf16.xpose.msk.msra.mxu1 %vm6451_vm1, %v6113_v51  ;;  %v7677_v14 = vpack.c.bf16 %v3955_v52, %v3954_v16  ;;  %v4568_v50 = vld [vmem:[%s8698_s0 + $0x2f1] sm:$0xff]  ;;  %v7721_v51 = vpack.c.bf16 %v3957_v39, %v3956_v26  ;;  %v3977_v16 = vld [vmem:[%s8698_s0 + $0x159] sm:$0xff]  ;;  %v4569_v52 = vld [vmem:[%s8698_s0 + $0x301] sm:$0xff] }
 0x107   :  { %5686 = vmatprep.subr.msk.bf16.mxu0 %vm6451_vm1, %v7584_v55  ;;  %6118 = vmatprep.subr.msk.bf16.mxu1 %vm6451_vm1, %v7586_v56  ;;  %v7727_v8 = vpack.c.bf16 %v4568_v50, %v4567_v38  ;;  %v7769_v11 = vpack.c.bf16 %v3977_v16, %v3976_v49  ;;  %v7771_v12 = vpack.c.bf16 %v4570_v53, %v4569_v52  ;;  %v3961_v26 = vld [vmem:[%s8698_s0 + $0x99] sm:$0xff]  ;;  %v4553_v39 = vld [vmem:[%s8698_s0 + $0x241] sm:$0xff]  ;;  %v3963_v49 = vld [vmem:[%s8698_s0 + $0xb1] sm:$0xff] }
 0x108   :  { %5042 = vmatprep.mubr.msk.f32.mxu0 %vm84_vm0, %v7593_v5  ;;  %5348 = vmatprep.mubr.msk.f32.mxu1 %vm84_vm0, %v7593_v5  ;;  %v4572_v38 = vld [vmem:[%s8698_s0 + $0x321] sm:$0xff]  ;;  %v7809_v50 = vpack.c.bf16 %v3961_v26, %v3960_v13  ;;  %v7811_v21 = vpack.c.bf16 %v4554_v40, %v4553_v39  ;;  %v4555_v16 = vld [vmem:[%s8698_s0 + $0x259] sm:$0xff]  ;;  %v3981_v13 = vld [vmem:[%s8698_s0 + $0x189] sm:$0xff]  ;;  %v7853_v40 = vpack.c.bf16 %v3963_v49, %v3962_v44 }
 0x109   :  { %v7815_v48 = vpack.c.bf16 %v4572_v38, %v4571_v37  ;;  %v4556_v52 = vld [vmem:[%s8698_s0 + $0x261] sm:$0xff]  ;;  %v4573_v26 = vld [vmem:[%s8698_s0 + $0x331] sm:$0xff]  ;;  %v4574_v39 = vld [vmem:[%s8698_s0 + $0x339] sm:$0xff] }
 0x10a   :  { %v3980_v53 = vld [vmem:[%s8698_s0 + $0x181] sm:$0xff]  ;;  %v7855_v35 = vpack.c.bf16 %v4556_v52, %v4555_v16  ;;  %v7859_v37 = vpack.c.bf16 %v4574_v39, %v4573_v26  ;;  %v3965_v44 = vld [vmem:[%s8698_s0 + $0xc9] sm:$0xff]  ;;  %v4557_v49 = vld [vmem:[%s8698_s0 + $0x271] sm:$0xff] }
 0x10b   :  { %v7857_v36 = vpack.c.bf16 %v3981_v13, %v3980_v53  ;;  %v3964_v38 = vld [vmem:[%s8698_s0 + $0xc1] sm:$0xff]  ;;  %v4558_v16 = vld [vmem:[%s8698_s0 + $0x279] sm:$0xff]  ;;  %v4101_v26 = vld [vmem:[%s8698_s0 + $0x110] sm:$0xff] }
 0x10c   :  { %v7885_v52 = vpack.c.bf16 %v3965_v44, %v3964_v38  ;;  %v7887_v53 = vpack.c.bf16 %v4558_v16, %v4557_v49  ;;  %v7908_v13 = vld [vmem:[%s8699_s1 + $0x28] sm:$0xff]  ;;  %v4693_v39 = vld [vmem:[%s8698_s0 + $0x2b8] sm:$0xff]  ;;  %v4694_v38 = vld [vmem:[%s8698_s0 + $0x2c0] sm:$0xff] }
 0x10e   :  { %5689 = vmatpush3.bf16.xpose.msk.msra.mxu0 %vm6451_vm1, %v7633_v45  ;;  %6121 = vmatpush3.bf16.xpose.msk.msra.mxu1 %vm6451_vm1, %v7635_v19 }
 0x10f   :  { %5692 = vmatprep.subr.msk.bf16.mxu0 %vm6451_vm1, %v7637_v20  ;;  %6124 = vmatprep.subr.msk.bf16.mxu1 %vm6451_vm1, %v7639_v41 }
 0x116   :  { %5695 = vmatpush3.bf16.xpose.msk.msra.mxu0 %vm6451_vm1, %v7677_v14  ;;  %6127 = vmatpush3.bf16.xpose.msk.msra.mxu1 %vm6451_vm1, %v7679_v23 }
 0x117   :  { %5698 = vmatprep.subr.msk.bf16.mxu0 %vm6451_vm1, %v7681_v24  ;;  %6130 = vmatprep.subr.msk.bf16.mxu1 %vm6451_vm1, %v7683_v25 }
 0x11e   :  { %5701 = vmatpush3.bf16.xpose.msk.msra.mxu0 %vm6451_vm1, %v7721_v51  ;;  %6133 = vmatpush3.bf16.xpose.msk.msra.mxu1 %vm6451_vm1, %v7723_v6 }
 0x11f   :  { %5704 = vmatprep.subr.msk.bf16.mxu0 %vm6451_vm1, %v7725_v7  ;;  %6136 = vmatprep.subr.msk.bf16.mxu1 %vm6451_vm1, %v7727_v8 }
 0x126   :  { %5707 = vmatpush3.bf16.xpose.msk.msra.mxu0 %vm6451_vm1, %v7765_v62  ;;  %6139 = vmatpush3.bf16.xpose.msk.msra.mxu1 %vm6451_vm1, %v7767_v63 }
 0x127   :  { %5710 = vmatprep.subr.msk.bf16.mxu0 %vm6451_vm1, %v7769_v11  ;;  %6142 = vmatprep.subr.msk.bf16.mxu1 %vm6451_vm1, %v7771_v12 }
 0x12e   :  { %5713 = vmatpush3.bf16.xpose.msk.msra.mxu0 %vm6451_vm1, %v7809_v50  ;;  %6145 = vmatpush3.bf16.xpose.msk.msra.mxu1 %vm6451_vm1, %v7811_v21 }
 0x12f   :  { %5716 = vmatprep.subr.msk.bf16.mxu0 %vm6451_vm1, %v7813_v22  ;;  %6148 = vmatprep.subr.msk.bf16.mxu1 %vm6451_vm1, %v7815_v48 }
 0x136   :  { %5719 = vmatpush3.bf16.xpose.msk.msra.mxu0 %vm6451_vm1, %v7853_v40  ;;  %6151 = vmatpush3.bf16.xpose.msk.msra.mxu1 %vm6451_vm1, %v7855_v35 }
 0x137   :  { %5722 = vmatprep.subr.msk.bf16.mxu0 %vm6451_vm1, %v7857_v36  ;;  %6154 = vmatprep.subr.msk.bf16.mxu1 %vm6451_vm1, %v7859_v37 }
 0x13e   :  { %5725 = vmatpush3.bf16.xpose.msk.msra.mxu0 %vm6451_vm1, %v7885_v52  ;;  %6157 = vmatpush3.bf16.xpose.msk.msra.mxu1 %vm6451_vm1, %v7887_v53 }
 0x13f   :  { %5728 = vmatprep.subr.msk.bf16.mxu0 %vm6451_vm1, %v7110_v46  ;;  %6160 = vmatprep.subr.msk.bf16.mxu1 %vm6451_vm1, %v7112_v47  ;;  %v8711_v46 = vld [vmem:[#allocation5_spill] sm:$0xff]  ;;  %v8712_v47 = vld [vmem:[#allocation6_spill] sm:$0xff] }
 0x145   :  { %5043 = vmatmul.mubr.msk.f32.vlgmr.msra.gmra.mrb[0].mxu0 %vm84_vm0, %v7593_v5  ;;  %5349 = vmatmul.mubr.msk.f32.vlgmr.msra.gmra.mrb[0].mxu1 %vm84_vm0, %v7593_v5  ;;  %v4100_v5 = vld [vmem:[%s8698_s0 + $0x108] sm:$0xff] }
 0x146   :  { %5731 = vmatpush3.bf16.xpose.msk.msra.mxu0 %vm6451_vm1, %v7161_v2  ;;  %6163 = vmatpush3.bf16.xpose.msk.msra.mxu1 %vm6451_vm1, %v7163_v3  ;;  %v8713_v2 = vld [vmem:[#allocation7_spill] sm:$0xff]  ;;  %v4046_v3 = vld [vmem:[%s8698_s0 + $0x182] sm:$0xff]  ;;  %v5780_v16 = vpack.c.bf16 %v4101_v26, %v4100_v5 }
 0x147   :  { %5734 = vmatprep.subr.msk.bf16.mxu0 %vm6451_vm1, %v7165_v9  ;;  %6166 = vmatprep.subr.msk.bf16.mxu1 %vm6451_vm1, %v7167_v10  ;;  %v4047_v9 = vld [vmem:[%s8698_s0 + $0x18a] sm:$0xff]  ;;  %v4639_v10 = vld [vmem:[%s8698_s0 + $0x332] sm:$0xff] }
 0x148   :  { %5076 = vmatprep.mubr.msk.f32.mxu0 %vm84_vm0, %v7908_v13  ;;  %5382 = vmatprep.mubr.msk.f32.mxu1 %vm84_vm0, %v7908_v13 }
 0x14e   :  { %5737 = vmatpush3.bf16.xpose.msk.msra.mxu0 %vm6451_vm1, %v7205_v29  ;;  %6169 = vmatpush3.bf16.xpose.msk.msra.mxu1 %vm6451_vm1, %v7207_v30  ;;  %v4640_v29 = vld [vmem:[%s8698_s0 + $0x33a] sm:$0xff]  ;;  %v7998_v30 = vpack.c.bf16 %v4047_v9, %v4046_v3  ;;  %v4085_v3 = vld [vmem:[%s8698_s0 + $0x50] sm:$0xff] }
 0x14f   :  { %5740 = vmatprep.subr.msk.bf16.mxu0 %vm6451_vm1, %v7209_v31  ;;  %6172 = vmatprep.subr.msk.bf16.mxu1 %vm6451_vm1, %v7211_v32  ;;  %v8000_v31 = vpack.c.bf16 %v4640_v29, %v4639_v10  ;;  %v4030_v32 = vld [vmem:[%s8698_s0 + $0xc2] sm:$0xff] }
 0x150   :  { %v4678_v9 = vld [vmem:[%s8698_s0 + $0x200] sm:$0xff]  ;;  %v4103_v29 = vld [vmem:[%s8698_s0 + $0x128] sm:$0xff] }
 0x151   :  { %v4102_v10 = vld [vmem:[%s8698_s0 + $0x120] sm:$0xff] }
 0x156   :  { %5743 = vmatpush3.bf16.xpose.msk.msra.mxu0 %vm6451_vm1, %v7249_v54  ;;  %6175 = vmatpush3.bf16.xpose.msk.msra.mxu1 %vm6451_vm1, %v7251_v57  ;;  %v4031_v54 = vld [vmem:[%s8698_s0 + $0xca] sm:$0xff]  ;;  %v4623_v57 = vld [vmem:[%s8698_s0 + $0x272] sm:$0xff] }
 0x157   :  { %5746 = vmatprep.subr.msk.bf16.mxu0 %vm6451_vm1, %v7253_v58  ;;  %6178 = vmatprep.subr.msk.bf16.mxu1 %vm6451_vm1, %v7255_v59  ;;  %v4624_v58 = vld [vmem:[%s8698_s0 + $0x27a] sm:$0xff]  ;;  %v4098_v59 = vld [vmem:[%s8698_s0 + $0xf0] sm:$0xff] }
 0x15e   :  { %5749 = vmatpush3.bf16.xpose.msk.msra.mxu0 %vm6451_vm1, %v7293_v27  ;;  %6181 = vmatpush3.bf16.xpose.msk.msra.mxu1 %vm6451_vm1, %v7295_v28  ;;  %v4099_v27 = vld [vmem:[%s8698_s0 + $0xf8] sm:$0xff]  ;;  %v4691_v28 = vld [vmem:[%s8698_s0 + $0x2a0] sm:$0xff] }
 0x15f   :  { %5752 = vmatprep.subr.msk.bf16.mxu0 %vm6451_vm1, %v7297_v33  ;;  %6184 = vmatprep.subr.msk.bf16.mxu1 %vm6451_vm1, %v7299_v34  ;;  %v4692_v33 = vld [vmem:[%s8698_s0 + $0x2a8] sm:$0xff]  ;;  %v8038_v34 = vpack.c.bf16 %v4031_v54, %v4030_v32  ;;  %v4695_v32 = vld [vmem:[%s8698_s0 + $0x2d0] sm:$0xff]  ;;  %v4696_v54 = vld [vmem:[%s8698_s0 + $0x2d8] sm:$0xff] }
 0x166   :  { %5755 = vmatpush3.bf16.xpose.msk.msra.mxu0 %vm6451_vm1, %v7337_v15  ;;  %6187 = vmatpush3.bf16.xpose.msk.msra.mxu1 %vm6451_vm1, %v8711_v46  ;;  %v8040_v15 = vpack.c.bf16 %v4624_v58, %v4623_v57  ;;  %v6212_v46 = vpack.c.bf16 %v4694_v38, %v4693_v39 }
 0x167   :  { %5758 = vmatprep.subr.msk.bf16.mxu0 %vm6451_vm1, %v8712_v47  ;;  %6190 = vmatprep.subr.msk.bf16.mxu1 %vm6451_vm1, %v8713_v2  ;;  %v8083_v47 = vld [vmem:[%s8699_s1 + $0x30] sm:$0xff]  ;;  %v4084_v2 = vld [vmem:[%s8698_s0 + $0x48] sm:$0xff] }
 0x168   :  { %v5783_v57 = vpack.c.bf16 %v4085_v3, %v4084_v2  ;;  %v4106_v2 = vld [vmem:[%s8698_s0 + $0x150] sm:$0xff]  ;;  %v4107_v3 = vld [vmem:[%s8698_s0 + $0x158] sm:$0xff] }
 0x16e   :  { %5761 = vmatpush3.bf16.xpose.msk.msra.mxu0 %vm6451_vm1, %v7381_v60  ;;  %6193 = vmatpush3.bf16.xpose.msk.msra.mxu1 %vm6451_vm1, %v7383_v61  ;;  %v4082_v60 = vld [vmem:[%s8698_s0 + $0x30] sm:$0xff]  ;;  %v4083_v61 = vld [vmem:[%s8698_s0 + $0x38] sm:$0xff] }
 0x16f   :  { %5764 = vmatprep.subr.msk.bf16.mxu0 %vm6451_vm1, %v7385_v18  ;;  %6196 = vmatprep.subr.msk.bf16.mxu1 %vm6451_vm1, %v7387_v17  ;;  %v5774_v17 = vpack.c.bf16 %v4099_v27, %v4098_v59  ;;  %v6206_v18 = vpack.c.bf16 %v4692_v33, %v4691_v28  ;;  %v5777_v44 = vpack.c.bf16 %v4083_v61, %v4082_v60  ;;  %v4086_v28 = vld [vmem:[%s8698_s0 + $0x60] sm:$0xff]  ;;  %v4087_v33 = vld [vmem:[%s8698_s0 + $0x68] sm:$0xff]  ;;  %v4104_v60 = vld [vmem:[%s8698_s0 + $0x138] sm:$0xff] }
 0x170   :  { %v5786_v59 = vpack.c.bf16 %v4103_v29, %v4102_v10  ;;  %v6218_v27 = vpack.c.bf16 %v4696_v54, %v4695_v32  ;;  %v4105_v61 = vld [vmem:[%s8698_s0 + $0x140] sm:$0xff]  ;;  %v5789_v5 = vpack.c.bf16 %v4087_v33, %v4086_v28  ;;  %v5798_v32 = vpack.c.bf16 %v4107_v3, %v4106_v2  ;;  %v4108_v28 = vld [vmem:[%s8698_s0 + $0x168] sm:$0xff]  ;;  %v4109_v33 = vld [vmem:[%s8698_s0 + $0x170] sm:$0xff] }
 0x171   :  { %v5792_v39 = vpack.c.bf16 %v4105_v61, %v4104_v60  ;;  %v4687_v2 = vld [vmem:[%s8698_s0 + $0x270] sm:$0xff]  ;;  %v4688_v3 = vld [vmem:[%s8698_s0 + $0x278] sm:$0xff] }
 0x176   :  { %5767 = vmatpush3.bf16.xpose.msk.msra.mxu0 %vm6451_vm1, %v7413_v42  ;;  %6199 = vmatpush3.bf16.xpose.msk.msra.mxu1 %vm6451_vm1, %v7415_v43  ;;  %v4675_v42 = vld [vmem:[%s8698_s0 + $0x1e0] sm:$0xff]  ;;  %v4676_v43 = vld [vmem:[%s8698_s0 + $0x1e8] sm:$0xff] }
 0x177   :  { %5770 = vmatprep.subr.msk.bf16.mxu0 %vm6451_vm1, %v7998_v30  ;;  %6202 = vmatprep.subr.msk.bf16.mxu1 %vm6451_vm1, %v8000_v31  ;;  %v6209_v49 = vpack.c.bf16 %v4676_v43, %v4675_v42  ;;  %v4697_v42 = vld [vmem:[%s8698_s0 + $0x2e8] sm:$0xff]  ;;  %v4698_v43 = vld [vmem:[%s8698_s0 + $0x2f0] sm:$0xff] }
 0x178   :  { %v6224_v38 = vpack.c.bf16 %v4698_v43, %v4697_v42  ;;  %v5804_v42 = vpack.c.bf16 %v4109_v33, %v4108_v28 }
 0x17e   :  { %5773 = vmatpush3.bf16.xpose.msk.msra.mxu0 %vm6451_vm1, %v8038_v34  ;;  %6205 = vmatpush3.bf16.xpose.msk.msra.mxu1 %vm6451_vm1, %v8040_v15 }
 0x17f   :  { %5776 = vmatprep.subr.msk.bf16.mxu0 %vm6451_vm1, %v5774_v17  ;;  %6208 = vmatprep.subr.msk.bf16.mxu1 %vm6451_vm1, %v6206_v18  ;;  %v4679_v17 = vld [vmem:[%s8698_s0 + $0x210] sm:$0xff]  ;;  %v4680_v18 = vld [vmem:[%s8698_s0 + $0x218] sm:$0xff] }
 0x180   :  { %v6221_v26 = vpack.c.bf16 %v4680_v18, %v4679_v17  ;;  %v4701_v17 = vld [vmem:[%s8698_s0 + $0x318] sm:$0xff]  ;;  %v4702_v18 = vld [vmem:[%s8698_s0 + $0x320] sm:$0xff] }
 0x181   :  { %v6236_v43 = vpack.c.bf16 %v4702_v18, %v4701_v17  ;;  %v8308_v17 = vld [vmem:[%s8699_s1 + $0x38] sm:$0xff] }
 0x185   :  { %5077 = vmatmul.mubr.msk.f32.vlgmr.msra.gmra.mrb[0].mxu0 %vm84_vm0, %v7908_v13  ;;  %5383 = vmatmul.mubr.msk.f32.vlgmr.msra.gmra.mrb[0].mxu1 %vm84_vm0, %v7908_v13  ;;  %v4677_v13 = vld [vmem:[%s8698_s0 + $0x1f8] sm:$0xff] }
 0x186   :  { %5779 = vmatpush3.bf16.xpose.msk.msra.mxu0 %vm6451_vm1, %v5777_v44  ;;  %6211 = vmatpush3.bf16.xpose.msk.msra.mxu1 %vm6451_vm1, %v6209_v49  ;;  %v6215_v58 = vpack.c.bf16 %v4678_v9, %v4677_v13  ;;  %v4088_v44 = vld [vmem:[%s8698_s0 + $0x78] sm:$0xff]  ;;  %v4089_v49 = vld [vmem:[%s8698_s0 + $0x80] sm:$0xff]  ;;  %v4700_v9 = vld [vmem:[%s8698_s0 + $0x308] sm:$0xff] }
 0x187   :  { %5782 = vmatprep.subr.msk.bf16.mxu0 %vm6451_vm1, %v5780_v16  ;;  %6214 = vmatprep.subr.msk.bf16.mxu1 %vm6451_vm1, %v6212_v46  ;;  %v4681_v16 = vld [vmem:[%s8698_s0 + $0x228] sm:$0xff]  ;;  %v4682_v46 = vld [vmem:[%s8698_s0 + $0x230] sm:$0xff]  ;;  %v4699_v13 = vld [vmem:[%s8698_s0 + $0x300] sm:$0xff]  ;;  %v5795_v10 = vpack.c.bf16 %v4089_v49, %v4088_v44 }
 0x188   :  { %5110 = vmatprep.mubr.msk.f32.mxu0 %vm84_vm0, %v8083_v47  ;;  %5416 = vmatprep.mubr.msk.f32.mxu1 %vm84_vm0, %v8083_v47  ;;  %v6227_v29 = vpack.c.bf16 %v4682_v46, %v4681_v16  ;;  %v6230_v54 = vpack.c.bf16 %v4700_v9, %v4699_v13  ;;  %v4094_v16 = vld [vmem:[%s8698_s0 + $0xc0] sm:$0xff]  ;;  %v4095_v46 = vld [vmem:[%s8698_s0 + $0xc8] sm:$0xff]  ;;  %v4112_v13 = vld [vmem:[%s8698_s0 + $0x198] sm:$0xff] }
 0x189   :  { %v4706_v9 = vld [vmem:[%s8698_s0 + $0x350] sm:$0xff] }
 0x18e   :  { %5785 = vmatpush3.bf16.xpose.msk.msra.mxu0 %vm6451_vm1, %v5783_v57  ;;  %6217 = vmatpush3.bf16.xpose.msk.msra.mxu1 %vm6451_vm1, %v6215_v58  ;;  %v4090_v57 = vld [vmem:[%s8698_s0 + $0x90] sm:$0xff]  ;;  %v4091_v58 = vld [vmem:[%s8698_s0 + $0x98] sm:$0xff] }
 0x18f   :  { %5788 = vmatprep.subr.msk.bf16.mxu0 %vm6451_vm1, %v5786_v59  ;;  %6220 = vmatprep.subr.msk.bf16.mxu1 %vm6451_vm1, %v6218_v27  ;;  %v4683_v59 = vld [vmem:[%s8698_s0 + $0x240] sm:$0xff]  ;;  %v4684_v27 = vld [vmem:[%s8698_s0 + $0x248] sm:$0xff]  ;;  %v5801_v60 = vpack.c.bf16 %v4091_v58, %v4090_v57  ;;  %v4096_v57 = vld [vmem:[%s8698_s0 + $0xd8] sm:$0xff] }
 0x190   :  { %v6233_v61 = vpack.c.bf16 %v4684_v27, %v4683_v59  ;;  %v4097_v58 = vld [vmem:[%s8698_s0 + $0xe0] sm:$0xff]  ;;  %v4689_v59 = vld [vmem:[%s8698_s0 + $0x288] sm:$0xff]  ;;  %v4690_v27 = vld [vmem:[%s8698_s0 + $0x290] sm:$0xff] }
 0x191   :  { %v5819_v28 = vpack.c.bf16 %v4097_v58, %v4096_v57  ;;  %v6251_v33 = vpack.c.bf16 %v4690_v27, %v4689_v59  ;;  %v4830_v57 = vld [vmem:[%s8698_s0 + $0x2f2] sm:$0xff] }
 0x196   :  { %5791 = vmatpush3.bf16.xpose.msk.msra.mxu0 %vm6451_vm1, %v5789_v5  ;;  %6223 = vmatpush3.bf16.xpose.msk.msra.mxu1 %vm6451_vm1, %v6221_v26  ;;  %v4092_v5 = vld [vmem:[%s8698_s0 + $0xa8] sm:$0xff]  ;;  %v4093_v26 = vld [vmem:[%s8698_s0 + $0xb0] sm:$0xff] }
 0x197   :  { %5794 = vmatprep.subr.msk.bf16.mxu0 %vm6451_vm1, %v5792_v39  ;;  %6226 = vmatprep.subr.msk.bf16.mxu1 %vm6451_vm1, %v6224_v38  ;;  %v4685_v39 = vld [vmem:[%s8698_s0 + $0x258] sm:$0xff]  ;;  %v4686_v38 = vld [vmem:[%s8698_s0 + $0x260] sm:$0xff]  ;;  %v5807_v44 = vpack.c.bf16 %v4093_v26, %v4092_v5 }
 0x198   :  { %v6239_v49 = vpack.c.bf16 %v4686_v38, %v4685_v39  ;;  %v4217_v5 = vld [vmem:[%s8698_s0 + $0x52] sm:$0xff]  ;;  %v4809_v26 = vld [vmem:[%s8698_s0 + $0x1fa] sm:$0xff]  ;;  %v4810_v39 = vld [vmem:[%s8698_s0 + $0x202] sm:$0xff] }
 0x199   :  { %v4234_v38 = vld [vmem:[%s8698_s0 + $0x122] sm:$0xff] }
 0x19e   :  { %5797 = vmatpush3.bf16.xpose.msk.msra.mxu0 %vm6451_vm1, %v5795_v10  ;;  %6229 = vmatpush3.bf16.xpose.msk.msra.mxu1 %vm6451_vm1, %v6227_v29  ;;  %v5813_v10 = vpack.c.bf16 %v4095_v46, %v4094_v16  ;;  %v6245_v29 = vpack.c.bf16 %v4688_v3, %v4687_v2  ;;  %v4828_v16 = vld [vmem:[%s8698_s0 + $0x2da] sm:$0xff]  ;;  %v6311_v2 = vpack.c.bf16 %v4810_v39, %v4809_v26 }
 0x19f   :  { %5800 = vmatprep.subr.msk.bf16.mxu0 %vm6451_vm1, %v5798_v32  ;;  %6232 = vmatprep.subr.msk.bf16.mxu1 %vm6451_vm1, %v6230_v54 }
 0x1a6   :  { %5803 = vmatpush3.bf16.xpose.msk.msra.mxu0 %vm6451_vm1, %v5801_v60  ;;  %6235 = vmatpush3.bf16.xpose.msk.msra.mxu1 %vm6451_vm1, %v6233_v61 }
 0x1a7   :  { %5806 = vmatprep.subr.msk.bf16.mxu0 %vm6451_vm1, %v5804_v42  ;;  %6238 = vmatprep.subr.msk.bf16.mxu1 %vm6451_vm1, %v6236_v43  ;;  %v8474_v42 = vld [vmem:[%s8699_s1 + $0x40] sm:$0xff]  ;;  %v4216_v43 = vld [vmem:[%s8698_s0 + $0x4a] sm:$0xff] }
 0x1a8   :  { %v5879_v46 = vpack.c.bf16 %v4217_v5, %v4216_v43  ;;  %v4229_v5 = vld [vmem:[%s8698_s0 + $0xe2] sm:$0xff] }
 0x1ae   :  { %5809 = vmatpush3.bf16.xpose.msk.msra.mxu0 %vm6451_vm1, %v5807_v44  ;;  %6241 = vmatpush3.bf16.xpose.msk.msra.mxu1 %vm6451_vm1, %v6239_v49  ;;  %v4235_v44 = vld [vmem:[%s8698_s0 + $0x12a] sm:$0xff]  ;;  %v4827_v49 = vld [vmem:[%s8698_s0 + $0x2d2] sm:$0xff] }
 0x1af   :  { %5812 = vmatprep.subr.msk.bf16.mxu0 %vm6451_vm1, %v7522_v0  ;;  %6244 = vmatprep.subr.msk.bf16.mxu1 %vm6451_vm1, %v7524_v1  ;;  %v4113_v0 = vld [vmem:[%s8698_s0 + $0x1a0] sm:$0xff]  ;;  %v4705_v1 = vld [vmem:[%s8698_s0 + $0x348] sm:$0xff]  ;;  %v5882_v3 = vpack.c.bf16 %v4235_v44, %v4234_v38 }
 0x1b0   :  { %v5816_v32 = vpack.c.bf16 %v4113_v0, %v4112_v13  ;;  %v6248_v54 = vpack.c.bf16 %v4706_v9, %v4705_v1  ;;  %v6314_v13 = vpack.c.bf16 %v4828_v16, %v4827_v49  ;;  %v4218_v0 = vld [vmem:[%s8698_s0 + $0x62] sm:$0xff]  ;;  %v4219_v1 = vld [vmem:[%s8698_s0 + $0x6a] sm:$0xff]  ;;  %v4811_v9 = vld [vmem:[%s8698_s0 + $0x212] sm:$0xff] }
 0x1b1   :  { %v5885_v58 = vpack.c.bf16 %v4219_v1, %v4218_v0 }
 0x1b6   :  { %5815 = vmatpush3.bf16.xpose.msk.msra.mxu0 %vm6451_vm1, %v5813_v10  ;;  %6247 = vmatpush3.bf16.xpose.msk.msra.mxu1 %vm6451_vm1, %v6245_v29  ;;  %v4812_v10 = vld [vmem:[%s8698_s0 + $0x21a] sm:$0xff] }
 0x1b7   :  { %5818 = vmatprep.subr.msk.bf16.mxu0 %vm6451_vm1, %v5816_v32  ;;  %6250 = vmatprep.subr.msk.bf16.mxu1 %vm6451_vm1, %v6248_v54  ;;  %v4236_v29 = vld [vmem:[%s8698_s0 + $0x13a] sm:$0xff]  ;;  %v4237_v32 = vld [vmem:[%s8698_s0 + $0x142] sm:$0xff]  ;;  %v4829_v54 = vld [vmem:[%s8698_s0 + $0x2ea] sm:$0xff]  ;;  %v6317_v59 = vpack.c.bf16 %v4812_v10, %v4811_v9 }
 0x1b8   :  { %v5888_v27 = vpack.c.bf16 %v4237_v32, %v4236_v29 }
 0x1be   :  { %5821 = vmatpush3.bf16.xpose.msk.msra.mxu0 %vm6451_vm1, %v5819_v28  ;;  %6253 = vmatpush3.bf16.xpose.msk.msra.mxu1 %vm6451_vm1, %v6251_v33  ;;  %v6320_v28 = vpack.c.bf16 %v4830_v57, %v4829_v54  ;;  %v4220_v33 = vld [vmem:[%s8698_s0 + $0x7a] sm:$0xff] }
 0x1bf   :  { %5824 = vmatprep.subr.msk.bf16.mxu0 %vm6451_vm1, %v7584_v55  ;;  %6256 = vmatprep.subr.msk.bf16.mxu1 %vm6451_vm1, %v7586_v56  ;;  %v1869_v55 = vld [vmem:[%s8700_s2] sm:$0xff]  ;;  %v6411_v56 = vmov 0  }
 0x1c0   :  { %6386 = vset.pattern.permute.xlu0 %v6411_v56  ;;  %v4814_v56 = vld [vmem:[%s8698_s0 + $0x232] sm:$0xff] }
 0x1c1   :  { %1872 = vperm.xlu0 %6386, %v1869_v55  }
 0x1c5   :  { %5111 = vmatmul.mubr.msk.f32.vlgmr.msra.gmra.mrb[0].mxu0 %vm84_vm0, %v8083_v47  ;;  %5417 = vmatmul.mubr.msk.f32.vlgmr.msra.gmra.mrb[0].mxu1 %vm84_vm0, %v8083_v47 }
 0x1c6   :  { %5827 = vmatpush3.bf16.xpose.msk.msra.mxu0 %vm6451_vm1, %v7633_v45  ;;  %6259 = vmatpush3.bf16.xpose.msk.msra.mxu1 %vm6451_vm1, %v7635_v19  ;;  %v4178_v45 = vld [vmem:[%s8698_s0 + $0x199] sm:$0xff]  ;;  %v4179_v19 = vld [vmem:[%s8698_s0 + $0x1a1] sm:$0xff] }
 0x1c7   :  { %5830 = vmatprep.subr.msk.bf16.mxu0 %vm6451_vm1, %v7637_v20  ;;  %6262 = vmatprep.subr.msk.bf16.mxu1 %vm6451_vm1, %v7639_v41  ;;  %v4771_v20 = vld [vmem:[%s8698_s0 + $0x349] sm:$0xff]  ;;  %v4772_v41 = vld [vmem:[%s8698_s0 + $0x351] sm:$0xff] }
 0x1c8   :  { %5144 = vmatprep.mubr.msk.f32.mxu0 %vm84_vm0, %v8308_v17  ;;  %5450 = vmatprep.mubr.msk.f32.mxu1 %vm84_vm0, %v8308_v17 }
 0x1c9   :  { %3741 = vperm.xlu0 %6386, %v1869_v55   ;;  %v4813_v55 = vld [vmem:[%s8698_s0 + $0x22a] sm:$0xff] }
 0x1ce   :  { %5833 = vmatpush3.bf16.xpose.msk.msra.mxu0 %vm6451_vm1, %v7677_v14  ;;  %6265 = vmatpush3.bf16.xpose.msk.msra.mxu1 %vm6451_vm1, %v7679_v23  ;;  %v5864_v14 = vpack.c.bf16 %v4179_v19, %v4178_v45  ;;  %v6296_v23 = vpack.c.bf16 %v4772_v41, %v4771_v20  ;;  %v4238_v45 = vld [vmem:[%s8698_s0 + $0x152] sm:$0xff]  ;;  %v4239_v19 = vld [vmem:[%s8698_s0 + $0x15a] sm:$0xff]  ;;  %v4831_v20 = vld [vmem:[%s8698_s0 + $0x302] sm:$0xff] }
 0x1cf   :  { %5836 = vmatprep.subr.msk.bf16.mxu0 %vm6451_vm1, %v7681_v24  ;;  %6268 = vmatprep.subr.msk.bf16.mxu1 %vm6451_vm1, %v7683_v25  ;;  %v4162_v24 = vld [vmem:[%s8698_s0 + $0xd9] sm:$0xff]  ;;  %v4163_v25 = vld [vmem:[%s8698_s0 + $0xe1] sm:$0xff]  ;;  %v4832_v41 = vld [vmem:[%s8698_s0 + $0x30a] sm:$0xff] }
 0x1d6   :  { %5839 = vmatpush3.bf16.xpose.msk.msra.mxu0 %vm6451_vm1, %v7721_v51  ;;  %6271 = vmatpush3.bf16.xpose.msk.msra.mxu1 %vm6451_vm1, %v7723_v6  ;;  %v4755_v51 = vld [vmem:[%s8698_s0 + $0x289] sm:$0xff]  ;;  %v4756_v6 = vld [vmem:[%s8698_s0 + $0x291] sm:$0xff] }
 0x1d7   :  { %5842 = vmatprep.subr.msk.bf16.mxu0 %vm6451_vm1, %v7725_v7  ;;  %6274 = vmatprep.subr.msk.bf16.mxu1 %vm6451_vm1, %v7727_v8  ;;  %v4230_v7 = vld [vmem:[%s8698_s0 + $0xf2] sm:$0xff]  ;;  %v4231_v8 = vld [vmem:[%s8698_s0 + $0xfa] sm:$0xff] }
 0x1de   :  { %5845 = vmatpush3.bf16.xpose.msk.msra.mxu0 %vm6451_vm1, %v7765_v62  ;;  %6277 = vmatpush3.bf16.xpose.msk.msra.mxu1 %vm6451_vm1, %v7767_v63  ;;  %v4823_v62 = vld [vmem:[%s8698_s0 + $0x2a2] sm:$0xff]  ;;  %v4824_v63 = vld [vmem:[%s8698_s0 + $0x2aa] sm:$0xff] }
 0x1df   :  { %5848 = vmatprep.subr.msk.bf16.mxu0 %vm6451_vm1, %v7769_v11  ;;  %6280 = vmatprep.subr.msk.bf16.mxu1 %vm6451_vm1, %v7771_v12  ;;  %v5867_v11 = vpack.c.bf16 %v4163_v25, %v4162_v24  ;;  %v6299_v12 = vpack.c.bf16 %v4756_v6, %v4755_v51  ;;  %v5894_v24 = vpack.c.bf16 %v4239_v19, %v4238_v45  ;;  %v4222_v51 = vld [vmem:[%s8698_s0 + $0x92] sm:$0xff]  ;;  %v4223_v6 = vld [vmem:[%s8698_s0 + $0x9a] sm:$0xff] }
 0x1e0   :  { %v6326_v25 = vpack.c.bf16 %v4832_v41, %v4831_v20 }
 0x1e6   :  { %5851 = vmatpush3.bf16.xpose.msk.msra.mxu0 %vm6451_vm1, %v7809_v50  ;;  %6283 = vmatpush3.bf16.xpose.msk.msra.mxu1 %vm6451_vm1, %v7811_v21  ;;  %v5870_v50 = vpack.c.bf16 %v4231_v8, %v4230_v7  ;;  %v6302_v21 = vpack.c.bf16 %v4824_v63, %v4823_v62  ;;  %v4815_v7 = vld [vmem:[%s8698_s0 + $0x242] sm:$0xff]  ;;  %v4816_v8 = vld [vmem:[%s8698_s0 + $0x24a] sm:$0xff]  ;;  %v4241_v63 = vld [vmem:[%s8698_s0 + $0x172] sm:$0xff] }
 0x1e7   :  { %5854 = vmatprep.subr.msk.bf16.mxu0 %vm6451_vm1, %v7813_v22  ;;  %6286 = vmatprep.subr.msk.bf16.mxu1 %vm6451_vm1, %v7815_v48  ;;  %v4214_v22 = vld [vmem:[%s8698_s0 + $0x32] sm:$0xff]  ;;  %v4215_v48 = vld [vmem:[%s8698_s0 + $0x3a] sm:$0xff]  ;;  %v4240_v62 = vld [vmem:[%s8698_s0 + $0x16a] sm:$0xff] }
 0x1e8   :  { %v5873_v47 = vpack.c.bf16 %v4215_v48, %v4214_v22  ;;  %v5900_v22 = vpack.c.bf16 %v4241_v63, %v4240_v62 }
 0x1ee   :  { %5857 = vmatpush3.bf16.xpose.msk.msra.mxu0 %vm6451_vm1, %v7853_v40  ;;  %6289 = vmatpush3.bf16.xpose.msk.msra.mxu1 %vm6451_vm1, %v7855_v35  ;;  %v4807_v40 = vld [vmem:[%s8698_s0 + $0x1e2] sm:$0xff]  ;;  %v4808_v35 = vld [vmem:[%s8698_s0 + $0x1ea] sm:$0xff] }
 0x1ef   :  { %5860 = vmatprep.subr.msk.bf16.mxu0 %vm6451_vm1, %v7857_v36  ;;  %6292 = vmatprep.subr.msk.bf16.mxu1 %vm6451_vm1, %v7859_v37  ;;  %v4232_v36 = vld [vmem:[%s8698_s0 + $0x10a] sm:$0xff]  ;;  %v4233_v37 = vld [vmem:[%s8698_s0 + $0x112] sm:$0xff]  ;;  %v6305_v18 = vpack.c.bf16 %v4808_v35, %v4807_v40 }
 0x1f0   :  { %v5876_v60 = vpack.c.bf16 %v4233_v37, %v4232_v36  ;;  %v4224_v40 = vld [vmem:[%s8698_s0 + $0xaa] sm:$0xff]  ;;  %v4225_v35 = vld [vmem:[%s8698_s0 + $0xb2] sm:$0xff]  ;;  %v4817_v36 = vld [vmem:[%s8698_s0 + $0x25a] sm:$0xff] }
 0x1f1   :  { %v4818_v37 = vld [vmem:[%s8698_s0 + $0x262] sm:$0xff] }
 0x1f6   :  { %5863 = vmatpush3.bf16.xpose.msk.msra.mxu0 %vm6451_vm1, %v7885_v52  ;;  %6295 = vmatpush3.bf16.xpose.msk.msra.mxu1 %vm6451_vm1, %v7887_v53  ;;  %v4825_v52 = vld [vmem:[%s8698_s0 + $0x2ba] sm:$0xff]  ;;  %v4826_v53 = vld [vmem:[%s8698_s0 + $0x2c2] sm:$0xff] }
 0x1f7   :  { %5866 = vmatprep.subr.msk.bf16.mxu0 %vm6451_vm1, %v5864_v14  ;;  %6298 = vmatprep.subr.msk.bf16.mxu1 %vm6451_vm1, %v6296_v23  ;;  %v6308_v61 = vpack.c.bf16 %v4826_v53, %v4825_v52  ;;  %v6323_v23 = vpack.c.bf16 %v4814_v56, %v4813_v55  ;;  %v5903_v52 = vpack.c.bf16 %v4225_v35, %v4224_v40 }
 0x1f8   :  { %v6335_v53 = vpack.c.bf16 %v4818_v37, %v4817_v36 }
 0x1fe   :  { %5869 = vmatpush3.bf16.xpose.msk.msra.mxu0 %vm6451_vm1, %v5867_v11  ;;  %6301 = vmatpush3.bf16.xpose.msk.msra.mxu1 %vm6451_vm1, %v6299_v12  ;;  %v4833_v11 = vld [vmem:[%s8698_s0 + $0x31a] sm:$0xff]  ;;  %v4834_v12 = vld [vmem:[%s8698_s0 + $0x322] sm:$0xff] }
 0x1ff   :  { %5872 = vmatprep.subr.msk.bf16.mxu0 %vm6451_vm1, %v5870_v50  ;;  %6304 = vmatprep.subr.msk.bf16.mxu1 %vm6451_vm1, %v6302_v21  ;;  %v5897_v50 = vpack.c.bf16 %v4223_v6, %v4222_v51  ;;  %v6329_v21 = vpack.c.bf16 %v4816_v8, %v4815_v7  ;;  %v6332_v48 = vpack.c.bf16 %v4834_v12, %v4833_v11 }
 0x205   :  { %5145 = vmatmul.mubr.msk.f32.vlgmr.msra.gmra.mrb[0].mxu0 %vm84_vm0, %v8308_v17  ;;  %5451 = vmatmul.mubr.msk.f32.vlgmr.msra.gmra.mrb[0].mxu1 %vm84_vm0, %v8308_v17  ;;  %v4221_v17 = vld [vmem:[%s8698_s0 + $0x82] sm:$0xff] }
 0x206   :  { %5875 = vmatpush3.bf16.xpose.msk.msra.mxu0 %vm6451_vm1, %v5873_v47  ;;  %6307 = vmatpush3.bf16.xpose.msk.msra.mxu1 %vm6451_vm1, %v6305_v18  ;;  %v5891_v14 = vpack.c.bf16 %v4221_v17, %v4220_v33  ;;  %v4244_v47 = vld [vmem:[%s8698_s0 + $0x19a] sm:$0xff]  ;;  %v4245_v18 = vld [vmem:[%s8698_s0 + $0x1a2] sm:$0xff] }
 0x207   :  { %5878 = vmatprep.subr.msk.bf16.mxu0 %vm6451_vm1, %v5876_v60  ;;  %6310 = vmatprep.subr.msk.bf16.mxu1 %vm6451_vm1, %v6308_v61  ;;  %v4837_v60 = vld [vmem:[%s8698_s0 + $0x34a] sm:$0xff]  ;;  %v5912_v61 = vpack.c.bf16 %v4245_v18, %v4244_v47 }
 0x208   :  { %5178 = vmatprep.mubr.msk.f32.mxu0 %vm84_vm0, %v8474_v42  ;;  %5484 = vmatprep.mubr.msk.f32.mxu1 %vm84_vm0, %v8474_v42 }
 0x20e   :  { %5881 = vmatpush3.bf16.xpose.msk.msra.mxu0 %vm6451_vm1, %v5879_v46  ;;  %6313 = vmatpush3.bf16.xpose.msk.msra.mxu1 %vm6451_vm1, %v6311_v2 }
 0x20f   :  { %5884 = vmatprep.subr.msk.bf16.mxu0 %vm6451_vm1, %v5882_v3  ;;  %6316 = vmatprep.subr.msk.bf16.mxu1 %vm6451_vm1, %v6314_v13 }
 0x216   :  { %5887 = vmatpush3.bf16.xpose.msk.msra.mxu0 %vm6451_vm1, %v5885_v58  ;;  %6319 = vmatpush3.bf16.xpose.msk.msra.mxu1 %vm6451_vm1, %v6317_v59 }
 0x217   :  { %5890 = vmatprep.subr.msk.bf16.mxu0 %vm6451_vm1, %v5888_v27  ;;  %6322 = vmatprep.subr.msk.bf16.mxu1 %vm6451_vm1, %v6320_v28 }
 0x21e   :  { %5893 = vmatpush3.bf16.xpose.msk.msra.mxu0 %vm6451_vm1, %v5891_v14  ;;  %6325 = vmatpush3.bf16.xpose.msk.msra.mxu1 %vm6451_vm1, %v6323_v23 }
 0x21f   :  { %5896 = vmatprep.subr.msk.bf16.mxu0 %vm6451_vm1, %v5894_v24  ;;  %6328 = vmatprep.subr.msk.bf16.mxu1 %vm6451_vm1, %v6326_v25 }
 0x226   :  { %5899 = vmatpush3.bf16.xpose.msk.msra.mxu0 %vm6451_vm1, %v5897_v50  ;;  %6331 = vmatpush3.bf16.xpose.msk.msra.mxu1 %vm6451_vm1, %v6329_v21 }
 0x227   :  { %5902 = vmatprep.subr.msk.bf16.mxu0 %vm6451_vm1, %v5900_v22  ;;  %6334 = vmatprep.subr.msk.bf16.mxu1 %vm6451_vm1, %v6332_v48 }
 0x22e   :  { %5905 = vmatpush3.bf16.xpose.msk.msra.mxu0 %vm6451_vm1, %v5903_v52  ;;  %6337 = vmatpush3.bf16.xpose.msk.msra.mxu1 %vm6451_vm1, %v6335_v53 }
 0x22f   :  { %5908 = vmatprep.subr.msk.bf16.mxu0 %vm6451_vm1, %v7998_v30  ;;  %6340 = vmatprep.subr.msk.bf16.mxu1 %vm6451_vm1, %v8000_v31  ;;  %v4838_v30 = vld [vmem:[%s8698_s0 + $0x352] sm:$0xff]  ;;  %v4228_v31 = vld [vmem:[%s8698_s0 + $0xda] sm:$0xff] }
 0x230   :  { %v6344_v43 = vpack.c.bf16 %v4838_v30, %v4837_v60  ;;  %v5915_v26 = vpack.c.bf16 %v4229_v5, %v4228_v31 }
 0x236   :  { %5911 = vmatpush3.bf16.xpose.msk.msra.mxu0 %vm6451_vm1, %v8038_v34  ;;  %6343 = vmatpush3.bf16.xpose.msk.msra.mxu1 %vm6451_vm1, %v8040_v15  ;;  %v4821_v34 = vld [vmem:[%s8698_s0 + $0x28a] sm:$0xff]  ;;  %v4822_v15 = vld [vmem:[%s8698_s0 + $0x292] sm:$0xff]  ;;  %s6412_s0 = smov [#allocation2]  }
 0x237   :  { %5914 = vmatprep.subr.msk.bf16.mxu0 %vm6451_vm1, %v5912_v61  ;;  %6346 = vmatprep.subr.msk.bf16.mxu1 %vm6451_vm1, %v6344_v43  ;;  %v6347_v39 = vpack.c.bf16 %v4822_v15, %v4821_v34  ;;  %s3768_s1 = sshll.u32 %s6412_s0, 4  ;;  %s3769_s1 = int_to_ptr.vmem [resolvable:$true] %s3768_s1 }
 0x238   :  { %s6387_s5 = scalar_lea.vmem %s3769_s1, 512  ;;  %p6392_p1 = scmp.lt.s32.totalorder %s3769_s1, %s3769_s1 }
 0x239   :  { %p6388_p0 = scmp.ne.s32.totalorder %s3769_s1, %s6387_s5  ;;  %p6393_p2 = scmp.lt.s32.totalorder %s6387_s5, %s6387_s5 }
 0x23b   :  { %p6394_p3 = por %p6393_p2, %p6392_p1 }
 0x23d   :  { %p6395_p4 = pnand %p6394_p3, %p6388_p0 }
 0x23e   :  { %5917 = vmatpush3.bf16.xpose.msk.msra.mxu0 %vm6451_vm1, %v5915_v26  ;;  %6349 = vmatpush3.bf16.xpose.msk.msra.mxu1 %vm6451_vm1, %v6347_v39 }
 0x240   :  { %v1873_v38 = vpop.permute.xlu0 %1872 }
 0x245   :  { %5179 = vmatmul.mubr.msk.f32.vlgmr.msra.gmra.mrb[0].mxu0 %vm84_vm0, %v8474_v42  ;;  %5485 = vmatmul.mubr.msk.f32.vlgmr.msra.gmra.mrb[0].mxu1 %vm84_vm0, %v8474_v42 }
 0x248   :  { %v3742_v44 = vpop.permute.xlu0 %3741 }
 0x318   :  { %v1862_v49 = vpop.f32.mrb[0].mxu0  ;;  %v3731_v16 = vpop.f32.mrb[0].mxu1 }
 0x319   :  { %v1875_v46 = vadd.f32 %v1873_v38, %v1862_v49  ;;  %v3744_v2 = vadd.f32 %v3742_v44, %v3731_v16  ;;  %v1864_v3 = vpop.f32.mrb[1].mxu0  ;;  %v3733_v13 = vpop.f32.mrb[1].mxu1 }
 0x31a   :  { %v1876_v0 = vadd.f32 %v1873_v38, %v1864_v3  ;;  %v3745_v1 = vadd.f32 %v3742_v44, %v3733_v13 }
 0x31b   :  { %1888 = vst [vmem:[#allocation2] sm:$0xff] %v1875_v46  ;;  %3758 = vst [vmem:[#allocation2 + $0x10] sm:$0xff] %v3744_v2 }
 0x31c   :  { %1889 = vst [vmem:[#allocation2 + $0x8] sm:$0xff] %v1876_v0  ;;  %3759 = vst [vmem:[#allocation2 + $0x18] sm:$0xff] %v3745_v1  ;;  %v1877_v4 = vadd.f32 %v1876_v0, %v1875_v46  ;;  %v3746_v9 = vadd.f32 %v3745_v1, %v3744_v2 }
 0x31e   :  { %1878 = vadd.xlane.f32.xlu1 %v1877_v4 }
 0x322   :  { %3747 = vadd.xlane.f32.xlu1 %v3746_v9 }
 0x3ab   :  { %v1879_v10 = vpop.xlane.xlu1 %1878 }
 0x3ac   :  { %v1880_v42 = vmul.f32 0.00390625, %v1879_v10 }
 0x3ae   :  { %v1881_v29 = vsub.f32 %v1875_v46, %v1880_v42  ;;  %v1882_v32 = vsub.f32 %v1876_v0, %v1880_v42 }
 0x3af   :  { %v3748_v54 = vpop.xlane.xlu1 %3747 }
 0x3b0   :  { %v3749_v57 = vmul.f32 0.00390625, %v3748_v54  ;;  %v1883_v58 = vmul.f32 %v1881_v29, %v1881_v29  ;;  %v1884_v59 = vmul.f32 %v1882_v32, %v1882_v32 }
 0x3b2   :  { %v1885_v27 = vadd.f32 %v1884_v59, %v1883_v58  ;;  %v3750_v28 = vsub.f32 %v3744_v2, %v3749_v57  ;;  %v3751_v33 = vsub.f32 %v3745_v1, %v3749_v57 }
 0x3b4   :  { %1886 = vadd.xlane.f32.xlu0 %v1885_v27  ;;  %v3752_v17 = vmul.f32 %v3750_v28, %v3750_v28  ;;  %v3753_v55 = vmul.f32 %v3751_v33, %v3751_v33 }
 0x3b6   :  { %v3754_v56 = vadd.f32 %v3753_v55, %v3752_v17 }
 0x3b8   :  { %3755 = vadd.xlane.f32.xlu1 %v3754_v56 }
 0x3b9   :  { %6398 = shalt.err (!%p6395_p4)
}
 0x3ba   :  { %s6399_s8 = scalar_lea.hbm %s8701_s3, 512 }
 0x3bb   :  { %p6400_p5 = scmp.ne.s32.totalorder %s8701_s3, %s6399_s8  ;;  %p6403_p6 = scmp.lt.u32.totalorder %s6399_s8, %s8701_s3 }
 0x3bd   :  { %p6405_p7 = pnand %p6403_p6, %p6400_p5 }
 0x3bf   :  { %6408 = shalt.err (!%p6405_p7)
}
 0x3c0   :  { %s6413_s2 = smov 256   ;;  %s6414_s13 = smov 16   ;;  %vm1890_vm2 = vcmask 7168   ;;  %vm1892_vm3 = vcmask 15360  }
 0x3c1   :  { %3774 = dma.vmem_to_hbm [thread:$0]  %s3769_s1, 512, %s8701_s3, [#allocation3], %s6413_s2, %s6413_s2, %s6414_s13  }
 0x441   :  { %v1887_v45 = vpop.xlane.xlu0 %1886 }
 0x442   :  { %v1891_v19 = vsel %vm1890_vm2, %v1880_v42, %v1887_v45 }
 0x443   :  { %1893 = vst.msk [vmem:[%s8702_s4] sm:$0xff] %vm1892_vm3, %v1891_v19 }
 0x445   :  { %v3756_v20 = vpop.xlane.xlu1 %3755 }
 0x446   :  { %v3760_v41 = vsel %vm1890_vm2, %v3749_v57, %v3756_v20 }
 0x447   :  { %4873 = vst.msk [vmem:[%s8702_s4 + $0x8] sm:$0xff] %vm1892_vm3, %v3760_v41 }
 0x448   :  { %6409 = dma.done.wait [#allocation3], 512  }
 0x449   :  { %6410 = vsyncadd [#allocation3], 4294966784 }
 0x44a   :  { %3782 = vsyncpa [#allocation3], 1 }

</bundles_post_ra>
